<compile_context>
chip_gen: v6e
topology: v6e:2x2x1
jax: 0.10.0
libtpu: 0.0.40
codegen_flags: <defaults>
</compile_context>

<pallas_src>
import functools
import math

import jax
import jax.numpy as jnp
from jax import lax
from jax.experimental import pallas as pl
from jax.experimental.pallas import tpu as pltpu


_VMEM_LIMIT_BYTES = 32 * 1024 * 1024   # safe on v5e/v6e (128 MiB) and v7x (64 MiB)
_COMPUTE_DTYPE = jnp.bfloat16          # MXU operand dtype; accumulation stays f32


def _round_up(x, m):
    return ((x + m - 1) // m) * m


def _pick_tile(dim, candidates):
    """Largest candidate tile that evenly divides `dim`, else the full dim."""
    for c in candidates:
        if dim >= c and dim % c == 0:
            return c
    return dim


# ----------------------------------------------------------------------------
# Tiled linear kernel:  out = x @ W + b
# ----------------------------------------------------------------------------
def _linear_kernel(x_ref, w_ref, b_ref, o_ref, acc_ref):
    k_idx = pl.program_id(2)

    @pl.when(k_idx == 0)
    def _init():
        acc_ref[...] = jnp.zeros_like(acc_ref)

    acc_ref[...] += jnp.dot(
        x_ref[...], w_ref[...], preferred_element_type=jnp.float32
    )

    @pl.when(k_idx == pl.num_programs(2) - 1)
    def _finalize():
        o_ref[...] = (acc_ref[...] + b_ref[...]).astype(o_ref.dtype)


def pallas_linear(x, w, b, out_dtype=jnp.float32):
    """x: (M, K) bf16, w: (K, N) bf16, b: (N,) f32 -> (M, N) out_dtype."""
    M, K = x.shape
    N = w.shape[1]

    # Tile M (pad to a tile multiple instead of a giant single block).
    if M >= 128:
        tm = 512 if M >= 512 else (256 if M >= 256 else 128)
    else:
        tm = M
    M_pad = _round_up(M, tm)
    tn = _pick_tile(N, (512, 256, 128))
    tk = _pick_tile(K, (512, 256, 128))

    if M_pad != M:
        x = jnp.pad(x, ((0, M_pad - M), (0, 0)))

    b2d = b.reshape(1, N).astype(jnp.float32)   # bias added in f32 to f32 accumulator

    out = pl.pallas_call(
        _linear_kernel,
        out_shape=jax.ShapeDtypeStruct((M_pad, N), out_dtype),
        grid_spec=pltpu.PrefetchScalarGridSpec(
            num_scalar_prefetch=0,
            grid=(M_pad // tm, N // tn, K // tk),
            in_specs=[
                pl.BlockSpec((tm, tk), lambda i, j, k: (i, k)),
                pl.BlockSpec((tk, tn), lambda i, j, k: (k, j)),
                pl.BlockSpec((1, tn), lambda i, j, k: (0, j)),
            ],
            out_specs=pl.BlockSpec((tm, tn), lambda i, j, k: (i, j)),
            scratch_shapes=[pltpu.VMEM((tm, tn), jnp.float32)],
        ),
        compiler_params=pltpu.CompilerParams(
            dimension_semantics=("parallel", "parallel", "arbitrary"),
            vmem_limit_bytes=_VMEM_LIMIT_BYTES,
        ),
    )(x, w, b2d)

    return out[:M] if M_pad != M else out


# ----------------------------------------------------------------------------
# Flash attention, head as a grid axis (d_k % 128 == 0): lane-aligned per-head tiles.
# Note: 1/sqrt(d_k) is already folded into W_q, so q arrives pre-scaled.
# ----------------------------------------------------------------------------
def _mha_flash_head_kernel(q_ref, k_ref, v_ref, o_ref, m_sc, l_sc, acc_sc,
                           *, tkv, seq_len, padded):
    kv_idx = pl.program_id(3)

    @pl.when(kv_idx == 0)
    def _init():
        m_sc[...] = jnp.full_like(m_sc, -jnp.inf)
        l_sc[...] = jnp.zeros_like(l_sc)
        acc_sc[...] = jnp.zeros_like(acc_sc)

    q = q_ref[0]   # (tq,  d_k) bf16, pre-scaled
    k = k_ref[0]   # (tkv, d_k) bf16
    v = v_ref[0]   # (tkv, d_k) bf16

    # scores = q @ k^T, contracting the last dims (no explicit transpose).
    s = lax.dot_general(
        q, k, (((1,), (1,)), ((), ())), preferred_element_type=jnp.float32
    )                                                       # (tq, tkv) f32
    if padded:
        col = kv_idx * tkv + lax.broadcasted_iota(jnp.int32, (1, tkv), 1)
        s = jnp.where(col < seq_len, s, -1e9)

    m_prev = m_sc[...]                                      # (tq, 1)
    m_new = jnp.maximum(m_prev, jnp.max(s, axis=-1, keepdims=True))
    alpha = jnp.exp(m_prev - m_new)
    p = jnp.exp(s - m_new)                                  # (tq, tkv) f32

    l_sc[...] = alpha * l_sc[...] + jnp.sum(p, axis=-1, keepdims=True)
    acc_sc[...] = alpha * acc_sc[...] + jnp.dot(
        p.astype(v.dtype), v, preferred_element_type=jnp.float32
    )
    m_sc[...] = m_new

    @pl.when(kv_idx == pl.num_programs(3) - 1)
    def _finalize():
        inv_l = pl.reciprocal(l_sc[...], approx=True)       # (tq, 1)
        o_ref[0] = (acc_sc[...] * inv_l).astype(o_ref.dtype)


# ----------------------------------------------------------------------------
# Flash attention, heads packed along the feature axis (d_k < 128 case).
# Each head processed fully before the next; finalize stores per-head slices directly.
# ----------------------------------------------------------------------------
def _mha_flash_packed_kernel(q_ref, k_ref, v_ref, o_ref, m_sc, l_sc, acc_sc,
                             *, n_heads, d_k, tkv, seq_len, padded):
    kv_idx = pl.program_id(2)

    @pl.when(kv_idx == 0)
    def _init():
        m_sc[...] = jnp.full_like(m_sc, -jnp.inf)
        l_sc[...] = jnp.zeros_like(l_sc)
        acc_sc[...] = jnp.zeros_like(acc_sc)

    q = q_ref[0]   # (tq,  d_model) bf16, pre-scaled
    k = k_ref[0]   # (tkv, d_model) bf16
    v = v_ref[0]   # (tkv, d_model) bf16

    if padded:
        col = kv_idx * tkv + lax.broadcasted_iota(jnp.int32, (1, tkv), 1)
        valid = col < seq_len                               # (1, tkv)

    for hh in range(n_heads):
        lo = hh * d_k
        qh = q[:, lo:lo + d_k]
        kh = k[:, lo:lo + d_k]
        vh = v[:, lo:lo + d_k]

        s = lax.dot_general(
            qh, kh, (((1,), (1,)), ((), ())), preferred_element_type=jnp.float32
        )                                                   # (tq, tkv) f32
        if padded:
            s = jnp.where(valid, s, -1e9)

        m_prev = m_sc[hh]                                   # (tq, 1)
        m_new = jnp.maximum(m_prev, jnp.max(s, axis=-1, keepdims=True))
        alpha = jnp.exp(m_prev - m_new)
        p = jnp.exp(s - m_new)                              # (tq, tkv) f32

        l_sc[hh] = alpha * l_sc[hh] + jnp.sum(p, axis=-1, keepdims=True)
        acc_sc[hh] = alpha * acc_sc[hh] + jnp.dot(
            p.astype(v.dtype), vh, preferred_element_type=jnp.float32
        )
        m_sc[hh] = m_new

    @pl.when(kv_idx == pl.num_programs(2) - 1)
    def _finalize():
        for hh in range(n_heads):
            inv_l = pl.reciprocal(l_sc[hh], approx=True)    # (tq, 1)
            # Per-head direct store (no full-tile concatenate / vreg blowup).
            o_ref[0, :, pl.ds(hh * d_k, d_k)] = (acc_sc[hh] * inv_l).astype(o_ref.dtype)


def pallas_attention(q, k, v, n_heads):
    """q, k, v: (B, S, d_model), heads packed along feature axis -> same shape."""
    B, S, d_model = q.shape
    d_k = d_model // n_heads

    # Sequence tile; keep a (t, d_model) bf16 block <= ~2 MiB.
    if S < 128:
        t = S
    else:
        t = 128
        for c in (512, 256):
            if S >= c and c * d_model * 2 <= (2 << 20):
                t = c
                break
    S_pad = _round_up(S, t)
    padded = S_pad != S
    if padded:
        pad = ((0, 0), (0, S_pad - S), (0, 0))
        q = jnp.pad(q, pad)
        k = jnp.pad(k, pad)
        v = jnp.pad(v, pad)

    use_head_grid = (d_k % 128 == 0)

    if use_head_grid:
        grid = (B, n_heads, S_pad // t, S_pad // t)
        kernel = functools.partial(
            _mha_flash_head_kernel, tkv=t, seq_len=S, padded=padded
        )
        q_spec = pl.BlockSpec((1, t, d_k), lambda b, hh, qi, ki: (b, qi, hh))
        kv_spec = pl.BlockSpec((1, t, d_k), lambda b, hh, qi, ki: (b, ki, hh))
        o_spec = pl.BlockSpec((1, t, d_k), lambda b, hh, qi, ki: (b, qi, hh))
        scratch = [
            pltpu.VMEM((t, 1), jnp.float32),      # running max m
            pltpu.VMEM((t, 1), jnp.float32),      # running sum l
            pltpu.VMEM((t, d_k), jnp.float32),    # running acc
        ]
        dims = ("parallel", "parallel", "parallel", "arbitrary")
    else:
        grid = (B, S_pad // t, S_pad // t)
        kernel = functools.partial(
            _mha_flash_packed_kernel,
            n_heads=n_heads, d_k=d_k, tkv=t, seq_len=S, padded=padded,
        )
        q_spec = pl.BlockSpec((1, t, d_model), lambda b, qi, ki: (b, qi, 0))
        kv_spec = pl.BlockSpec((1, t, d_model), lambda b, qi, ki: (b, ki, 0))
        o_spec = pl.BlockSpec((1, t, d_model), lambda b, qi, ki: (b, qi, 0))
        scratch = [
            pltpu.VMEM((n_heads, t, 1), jnp.float32),
            pltpu.VMEM((n_heads, t, 1), jnp.float32),
            pltpu.VMEM((n_heads, t, d_k), jnp.float32),
        ]
        dims = ("parallel", "parallel", "arbitrary")

    out = pl.pallas_call(
        kernel,
        out_shape=jax.ShapeDtypeStruct((B, S_pad, d_model), q.dtype),
        grid_spec=pltpu.PrefetchScalarGridSpec(
            num_scalar_prefetch=0,
            grid=grid,
            in_specs=[q_spec, kv_spec, kv_spec],
            out_specs=o_spec,
            scratch_shapes=scratch,
        ),
        compiler_params=pltpu.CompilerParams(
            dimension_semantics=dims,
            vmem_limit_bytes=_VMEM_LIMIT_BYTES,
        ),
    )(q, k, v)

    return out[:, :S, :] if padded else out


# ----------------------------------------------------------------------------
# Parameter preparation (done once): fold 1/sqrt(d_k) into W_q/b_q, cast to bf16.
# ----------------------------------------------------------------------------
def prepare_params(params, h):
    d_model = params[0][0].shape[0]
    d_k = d_model // h
    scale = 1.0 / math.sqrt(d_k)
    prepared = []
    for i, (W, b) in enumerate(params):
        if i == 0:   # query projection carries the attention scale
            W = W * scale
            b = b * scale
        prepared.append((W.astype(_COMPUTE_DTYPE), b.astype(jnp.float32)))
    return prepared


# ----------------------------------------------------------------------------
# MultiHeadAttention forward (mask=None path)
# ----------------------------------------------------------------------------
@functools.partial(jax.jit, static_argnums=(4,))
def multi_head_attention(query, key, value, params, h):
    """Matches MultiHeadAttention.forward (mask=None path).

    query/key/value: (B, S, d_model) f32  ->  (B, S, d_model) f32
    params: output of prepare_params(); 4 (W, b) tuples, W: (d_model, d_model) bf16
            applied as x @ W, b: (d_model,) f32. Correspond to self.linears[0..3].
    """
    B, S, d_model = query.shape

    def proj(x, wb):
        W, b = wb
        y = pallas_linear(
            x.reshape(B * S, d_model).astype(_COMPUTE_DTYPE),
            W, b, out_dtype=_COMPUTE_DTYPE,
        )
        # Heads stay packed along the feature axis: no (B,S,h,d_k)->(B,h,S,d_k)
        # transpose round-trips through HBM.
        return y.reshape(B, S, d_model)

    q = proj(query, params[0])   # pre-scaled by 1/sqrt(d_k) via W_q/b_q
    k = proj(key, params[1])
    v = proj(value, params[2])

    x = pallas_attention(q, k, v, h)                     # (B, S, d_model) bf16

    W_o, b_o = params[3]
    out = pallas_linear(
        x.reshape(B * S, d_model), W_o, b_o, out_dtype=jnp.float32
    )
    return out.reshape(B, S, d_model)


# ----------------------------------------------------------------------------
# Reference (plain JAX, f32) for sanity checking
# ----------------------------------------------------------------------------
def reference_mha(query, key, value, params, h):
    B, S, d_model = query.shape
    d_k = d_model // h

    def lin(x, wb):
        W, b = wb
        return x @ W + b

    q = lin(query, params[0]).reshape(B, S, h, d_k).transpose(0, 2, 1, 3)
    k = lin(key, params[1]).reshape(B, S, h, d_k).transpose(0, 2, 1, 3)
    v = lin(value, params[2]).reshape(B, S, h, d_k).transpose(0, 2, 1, 3)
    scores = jnp.einsum("bhqd,bhkd->bhqk", q, k) / math.sqrt(d_k)
    p = jax.nn.softmax(scores, axis=-1)
    x = jnp.einsum("bhqk,bhkd->bhqd", p, v)
    x = x.transpose(0, 2, 1, 3).reshape(B, S, d_model)
    return lin(x, params[3])


def _run_case(B, S, d_model, h, seed):
    keys = jax.random.split(jax.random.PRNGKey(seed), 12)

    # Deterministic parameter init for the 4 nn.Linear(d_model, d_model).
    # Stored as (W, b) with W shaped (in, out) so the kernel computes x @ W + b
    # (equivalent to PyTorch's x @ weight.T + bias).
    params = []
    for i in range(4):
        W = jax.random.normal(keys[i], (d_model, d_model), jnp.float32) * 0.05
        b = jax.random.normal(keys[4 + i], (d_model,), jnp.float32) * 0.05
        params.append((W, b))

    query = jax.random.normal(keys[8], (B, S, d_model), jnp.float32)
    key_t = jax.random.normal(keys[9], (B, S, d_model), jnp.float32)
    value = jax.random.normal(keys[10], (B, S, d_model), jnp.float32)

    prepared = prepare_params(params, h)
    out = multi_head_attention(query, key_t, value, prepared, h)
    out = jax.block_until_ready(out)

    ref = reference_mha(query, key_t, value, params, h)
    assert out.shape == (B, S, d_model)
    # bf16 MXU operands with f32 accumulation -> compare at bf16-level tolerance.
    err = float(jnp.max(jnp.abs(out - ref)))
    scale = float(jnp.max(jnp.abs(ref)))
    assert err <= 0.02 + 0.05 * scale, (
        f"mismatch vs reference: max abs err {err:.4f}, ref scale {scale:.4f}"
    )


if __name__ == "__main__":
    # Small module-spec shapes (packed-head path, single tile).
    _run_case(B=2, S=8, d_model=32, h=4, seed=0)
    # Larger shapes: exercises head-as-grid-axis path (d_k=128), sequence padding +
    # KV masking (S=200 -> 256) and padded-M tiled linears (M=400 -> 512).
    _run_case(B=2, S=200, d_model=256, h=2, seed=1)

    print("KERNEL_OK")
</pallas_src>

<mosaic_0001>
module attributes {stable_mosaic.version = 11 : i64} {
  func.func @_linear_kernel(%arg0: i32, %arg1: i32, %arg2: i32, %arg3: memref<16x32xbf16, #tpu.memory_space<vmem>>, %arg4: memref<32x32xbf16, #tpu.memory_space<vmem>>, %arg5: memref<1x32xf32, #tpu.memory_space<vmem>>, %arg6: memref<16x32xbf16, #tpu.memory_space<vmem>>, %arg7: memref<16x32xf32, #tpu.memory_space<vmem>>) attributes {dimension_semantics = [#tpu.dimension_semantics<parallel>, #tpu.dimension_semantics<parallel>, #tpu.dimension_semantics<arbitrary>], iteration_bounds = array<i64: 1, 1, 1>, scalar_prefetch = 0 : i64, scratch_operands = 1 : i64, tpu.core_type = #tpu.core_type<tc>, window_params = [{transform_indices = @transform_0, window_bounds = array<i64: 16, 32>}, {transform_indices = @transform_1, window_bounds = array<i64: 32, 32>}, {transform_indices = @transform_2, window_bounds = array<i64: 1, 32>}, {transform_indices = @transform_3, window_bounds = array<i64: 16, 32>}]} {
    %c0_i32 = arith.constant 0 : i32
    %0 = arith.cmpi eq, %arg2, %c0_i32 : i32
    %1 = arith.extui %0 : i1 to i32
    %c0_i32_0 = arith.constant 0 : i32
    %2 = arith.cmpi ne, %1, %c0_i32_0 : i32
    scf.if %2 {
      %cst_10 = arith.constant 0.000000e+00 : f32
      %12 = vector.broadcast %cst_10 : f32 to vector<16x32xf32>
      %c0_11 = arith.constant 0 : index
      %c0_12 = arith.constant 0 : index
      %13 = vector.load %arg7[%c0_11, %c0_12] : memref<16x32xf32, #tpu.memory_space<vmem>>, vector<16x32xf32>
      tpu.vector_store %arg7[%c0_11, %c0_12], %12 {strides = array<i32>} : memref<16x32xf32, #tpu.memory_space<vmem>>, vector<16x32xf32>,
    } else {
    }
    %c0 = arith.constant 0 : index
    %c0_1 = arith.constant 0 : index
    %3 = vector.load %arg7[%c0, %c0_1] : memref<16x32xf32, #tpu.memory_space<vmem>>, vector<16x32xf32>
    %c0_2 = arith.constant 0 : index
    %c0_3 = arith.constant 0 : index
    %4 = vector.load %arg3[%c0_2, %c0_3] : memref<16x32xbf16, #tpu.memory_space<vmem>>, vector<16x32xbf16>
    %c0_4 = arith.constant 0 : index
    %c0_5 = arith.constant 0 : index
    %5 = vector.load %arg4[%c0_4, %c0_5] : memref<32x32xbf16, #tpu.memory_space<vmem>>, vector<32x32xbf16>
    %cst = arith.constant dense<0.000000e+00> : vector<16x32xf32>
    %6 = tpu.matmul %4, %5, %cst {dimension_numbers = #tpu.dot_dimension_numbers<[1], [0], [0], [1], [0, 0, 1, 1], [], []>} : vector<16x32xbf16>, vector<32x32xbf16>, vector<16x32xf32> -> vector<16x32xf32>
    %7 = arith.addf %3, %6 : vector<16x32xf32>
    %c0_6 = arith.constant 0 : index
    %c0_7 = arith.constant 0 : index
    %8 = vector.load %arg7[%c0_6, %c0_7] : memref<16x32xf32, #tpu.memory_space<vmem>>, vector<16x32xf32>
    tpu.vector_store %arg7[%c0_6, %c0_7], %7 {strides = array<i32>} : memref<16x32xf32, #tpu.memory_space<vmem>>, vector<16x32xf32>,
    %c0_i32_8 = arith.constant 0 : i32
    %9 = arith.cmpi eq, %arg2, %c0_i32_8 : i32
    %10 = arith.extui %9 : i1 to i32
    %c0_i32_9 = arith.constant 0 : i32
    %11 = arith.cmpi ne, %10, %c0_i32_9 : i32
    scf.if %11 {
      %c0_10 = arith.constant 0 : index
      %c0_11 = arith.constant 0 : index
      %12 = vector.load %arg7[%c0_10, %c0_11] : memref<16x32xf32, #tpu.memory_space<vmem>>, vector<16x32xf32>
      %c0_12 = arith.constant 0 : index
      %c0_13 = arith.constant 0 : index
      %13 = vector.load %arg5[%c0_12, %c0_13] : memref<1x32xf32, #tpu.memory_space<vmem>>, vector<1x32xf32>
      %14 = vector.broadcast %13 : vector<1x32xf32> to vector<16x32xf32>
      %15 = arith.addf %12, %14 : vector<16x32xf32>
      %16 = arith.truncf %15 : vector<16x32xf32> to vector<16x32xbf16>
      %c0_14 = arith.constant 0 : index
      %c0_15 = arith.constant 0 : index
      %17 = vector.load %arg6[%c0_14, %c0_15] : memref<16x32xbf16, #tpu.memory_space<vmem>>, vector<16x32xbf16>
      tpu.vector_store %arg6[%c0_14, %c0_15], %16 {strides = array<i32>} : memref<16x32xbf16, #tpu.memory_space<vmem>>, vector<16x32xbf16>,
    } else {
    }
    return
  }
  func.func @transform_0(%arg0: i32, %arg1: i32, %arg2: i32) -> (i32, i32) {
    %c0_i32 = arith.constant 0 : i32
    return %arg0, %arg2 : i32, i32
  }
  func.func @transform_1(%arg0: i32, %arg1: i32, %arg2: i32) -> (i32, i32) {
    %c0_i32 = arith.constant 0 : i32
    return %arg2, %arg1 : i32, i32
  }
  func.func @transform_2(%arg0: i32, %arg1: i32, %arg2: i32) -> (i32, i32) {
    %c0_i32 = arith.constant 0 : i32
    %c0_i32_0 = arith.constant 0 : i32
    return %c0_i32, %arg1 : i32, i32
  }
  func.func @transform_3(%arg0: i32, %arg1: i32, %arg2: i32) -> (i32, i32) {
    %c0_i32 = arith.constant 0 : i32
    return %arg0, %arg1 : i32, i32
  }
}

module attributes {stable_mosaic.version = 11 : i64} {
  func.func @_mha_flash_packed_kernel(%arg0: i32, %arg1: i32, %arg2: i32, %arg3: memref<1x8x32xbf16, #tpu.memory_space<vmem>>, %arg4: memref<1x8x32xbf16, #tpu.memory_space<vmem>>, %arg5: memref<1x8x32xbf16, #tpu.memory_space<vmem>>, %arg6: memref<1x8x32xbf16, #tpu.memory_space<vmem>>, %arg7: memref<4x8x1xf32, #tpu.memory_space<vmem>>, %arg8: memref<4x8x1xf32, #tpu.memory_space<vmem>>, %arg9: memref<4x8x8xf32, #tpu.memory_space<vmem>>) attributes {dimension_semantics = [#tpu.dimension_semantics<parallel>, #tpu.dimension_semantics<parallel>, #tpu.dimension_semantics<arbitrary>], iteration_bounds = array<i64: 2, 1, 1>, scalar_prefetch = 0 : i64, scratch_operands = 3 : i64, tpu.core_type = #tpu.core_type<tc>, window_params = [{transform_indices = @transform_0, window_bounds = array<i64: 1, 8, 32>}, {transform_indices = @transform_1, window_bounds = array<i64: 1, 8, 32>}, {transform_indices = @transform_2, window_bounds = array<i64: 1, 8, 32>}, {transform_indices = @transform_3, window_bounds = array<i64: 1, 8, 32>}]} {
    %c0_i32 = arith.constant 0 : i32
    %0 = arith.cmpi eq, %arg2, %c0_i32 : i32
    %1 = arith.extui %0 : i1 to i32
    %c0_i32_0 = arith.constant 0 : i32
    %2 = arith.cmpi ne, %1, %c0_i32_0 : i32
    scf.if %2 {
      %cst_95 = arith.constant 0xFF800000 : f32
      %156 = vector.broadcast %cst_95 : f32 to vector<4x8x1xf32>
      %c0_96 = arith.constant 0 : index
      %c0_97 = arith.constant 0 : index
      %c0_98 = arith.constant 0 : index
      %157 = vector.load %arg7[%c0_96, %c0_97, %c0_98] : memref<4x8x1xf32, #tpu.memory_space<vmem>>, vector<4x8x1xf32>
      tpu.vector_store %arg7[%c0_96, %c0_97, %c0_98], %156 {strides = array<i32>} : memref<4x8x1xf32, #tpu.memory_space<vmem>>, vector<4x8x1xf32>,
      %cst_99 = arith.constant 0.000000e+00 : f32
      %158 = vector.broadcast %cst_99 : f32 to vector<4x8x1xf32>
      %c0_100 = arith.constant 0 : index
      %c0_101 = arith.constant 0 : index
      %c0_102 = arith.constant 0 : index
      %159 = vector.load %arg8[%c0_100, %c0_101, %c0_102] : memref<4x8x1xf32, #tpu.memory_space<vmem>>, vector<4x8x1xf32>
      tpu.vector_store %arg8[%c0_100, %c0_101, %c0_102], %158 {strides = array<i32>} : memref<4x8x1xf32, #tpu.memory_space<vmem>>, vector<4x8x1xf32>,
      %cst_103 = arith.constant 0.000000e+00 : f32
      %160 = vector.broadcast %cst_103 : f32 to vector<4x8x8xf32>
      %c0_104 = arith.constant 0 : index
      %c0_105 = arith.constant 0 : index
      %c0_106 = arith.constant 0 : index
      %161 = vector.load %arg9[%c0_104, %c0_105, %c0_106] : memref<4x8x8xf32, #tpu.memory_space<vmem>>, vector<4x8x8xf32>
      tpu.vector_store %arg9[%c0_104, %c0_105, %c0_106], %160 {strides = array<i32>} : memref<4x8x8xf32, #tpu.memory_space<vmem>>, vector<4x8x8xf32>,
    } else {
    }
    %c0 = arith.constant 0 : index
    %c0_1 = arith.constant 0 : index
    %c0_2 = arith.constant 0 : index
    %3 = vector.load %arg3[%c0, %c0_1, %c0_2] : memref<1x8x32xbf16, #tpu.memory_space<vmem>>, vector<1x8x32xbf16>
    %4 = vector.shape_cast %3 : vector<1x8x32xbf16> to vector<8x32xbf16>
    %c0_3 = arith.constant 0 : index
    %c0_4 = arith.constant 0 : index
    %c0_5 = arith.constant 0 : index
    %5 = vector.load %arg4[%c0_3, %c0_4, %c0_5] : memref<1x8x32xbf16, #tpu.memory_space<vmem>>, vector<1x8x32xbf16>
    %6 = vector.shape_cast %5 : vector<1x8x32xbf16> to vector<8x32xbf16>
    %c0_6 = arith.constant 0 : index
    %c0_7 = arith.constant 0 : index
    %c0_8 = arith.constant 0 : index
    %7 = vector.load %arg5[%c0_6, %c0_7, %c0_8] : memref<1x8x32xbf16, #tpu.memory_space<vmem>>, vector<1x8x32xbf16>
    %8 = vector.shape_cast %7 : vector<1x8x32xbf16> to vector<8x32xbf16>
    %9 = vector.extract_strided_slice %4 {offsets = [0, 0], sizes = [8, 8], strides = [1, 1]} : vector<8x32xbf16> to vector<8x8xbf16>
    %10 = vector.extract_strided_slice %6 {offsets = [0, 0], sizes = [8, 8], strides = [1, 1]} : vector<8x32xbf16> to vector<8x8xbf16>
    %11 = vector.extract_strided_slice %8 {offsets = [0, 0], sizes = [8, 8], strides = [1, 1]} : vector<8x32xbf16> to vector<8x8xbf16>
    %cst = arith.constant dense<0.000000e+00> : vector<8x8xf32>
    %12 = tpu.matmul %9, %10, %cst {dimension_numbers = #tpu.dot_dimension_numbers<[1], [1], [0], [0], [0, 0, 1, 0], [], []>} : vector<8x8xbf16>, vector<8x8xbf16>, vector<8x8xf32> -> vector<8x8xf32>
    %c0_9 = arith.constant 0 : index
    %c0_10 = arith.constant 0 : index
    %c0_11 = arith.constant 0 : index
    %13 = vector.load %arg7[%c0_9, %c0_10, %c0_11] : memref<4x8x1xf32, #tpu.memory_space<vmem>>, vector<1x8x1xf32>
    %14 = vector.shape_cast %13 : vector<1x8x1xf32> to vector<8x1xf32>
    %cst_12 = arith.constant dense<0xFF800000> : vector<8xf32>
    %15 = vector.multi_reduction <maximumf>, %12, %cst_12 [1] : vector<8x8xf32> to vector<8xf32>
    %16 = vector.shape_cast %15 : vector<8xf32> to vector<8x1xf32>
    %17 = arith.maximumf %14, %16 : vector<8x1xf32>
    %18 = arith.subf %14, %17 : vector<8x1xf32>
    %19 = math.exp %18 : vector<8x1xf32>
    %20 = vector.broadcast %17 : vector<8x1xf32> to vector<8x8xf32>
    %21 = arith.subf %12, %20 : vector<8x8xf32>
    %22 = math.exp %21 : vector<8x8xf32>
    %c0_13 = arith.constant 0 : index
    %c0_14 = arith.constant 0 : index
    %c0_15 = arith.constant 0 : index
    %23 = vector.load %arg8[%c0_13, %c0_14, %c0_15] : memref<4x8x1xf32, #tpu.memory_space<vmem>>, vector<1x8x1xf32>
    %24 = vector.shape_cast %23 : vector<1x8x1xf32> to vector<8x1xf32>
    %25 = arith.mulf %19, %24 : vector<8x1xf32>
    %cst_16 = arith.constant dense<0.000000e+00> : vector<8xf32>
    %26 = vector.multi_reduction <add>, %22, %cst_16 [1] : vector<8x8xf32> to vector<8xf32>
    %27 = vector.shape_cast %26 : vector<8xf32> to vector<8x1xf32>
    %28 = arith.addf %25, %27 : vector<8x1xf32>
    %c0_17 = arith.constant 0 : index
    %c0_18 = arith.constant 0 : index
    %c0_19 = arith.constant 0 : index
    %29 = vector.load %arg8[%c0_17, %c0_18, %c0_19] : memref<4x8x1xf32, #tpu.memory_space<vmem>>, vector<1x8x1xf32>
    %30 = vector.shape_cast %29 : vector<1x8x1xf32> to vector<8x1xf32>
    %31 = vector.shape_cast %28 : vector<8x1xf32> to vector<1x8x1xf32>
    tpu.vector_store %arg8[%c0_17, %c0_18, %c0_19], %31 {strides = array<i32>} : memref<4x8x1xf32, #tpu.memory_space<vmem>>, vector<1x8x1xf32>,
    %c0_20 = arith.constant 0 : index
    %c0_21 = arith.constant 0 : index
    %c0_22 = arith.constant 0 : index
    %32 = vector.load %arg9[%c0_20, %c0_21, %c0_22] : memref<4x8x8xf32, #tpu.memory_space<vmem>>, vector<1x8x8xf32>
    %33 = vector.shape_cast %32 : vector<1x8x8xf32> to vector<8x8xf32>
    %34 = vector.broadcast %19 : vector<8x1xf32> to vector<8x8xf32>
    %35 = arith.mulf %34, %33 : vector<8x8xf32>
    %36 = arith.truncf %22 : vector<8x8xf32> to vector<8x8xbf16>
    %cst_23 = arith.constant dense<0.000000e+00> : vector<8x8xf32>
    %37 = tpu.matmul %36, %11, %cst_23 {dimension_numbers = #tpu.dot_dimension_numbers<[1], [0], [0], [1], [0, 0, 1, 1], [], []>} : vector<8x8xbf16>, vector<8x8xbf16>, vector<8x8xf32> -> vector<8x8xf32>
    %38 = arith.addf %35, %37 : vector<8x8xf32>
    %c0_24 = arith.constant 0 : index
    %c0_25 = arith.constant 0 : index
    %c0_26 = arith.constant 0 : index
    %39 = vector.load %arg9[%c0_24, %c0_25, %c0_26] : memref<4x8x8xf32, #tpu.memory_space<vmem>>, vector<1x8x8xf32>
    %40 = vector.shape_cast %39 : vector<1x8x8xf32> to vector<8x8xf32>
    %41 = vector.shape_cast %38 : vector<8x8xf32> to vector<1x8x8xf32>
    tpu.vector_store %arg9[%c0_24, %c0_25, %c0_26], %41 {strides = array<i32>} : memref<4x8x8xf32, #tpu.memory_space<vmem>>, vector<1x8x8xf32>,
    %c0_27 = arith.constant 0 : index
    %c0_28 = arith.constant 0 : index
    %c0_29 = arith.constant 0 : index
    %42 = vector.load %arg7[%c0_27, %c0_28, %c0_29] : memref<4x8x1xf32, #tpu.memory_space<vmem>>, vector<1x8x1xf32>
    %43 = vector.shape_cast %42 : vector<1x8x1xf32> to vector<8x1xf32>
    %44 = vector.shape_cast %17 : vector<8x1xf32> to vector<1x8x1xf32>
    tpu.vector_store %arg7[%c0_27, %c0_28, %c0_29], %44 {strides = array<i32>} : memref<4x8x1xf32, #tpu.memory_space<vmem>>, vector<1x8x1xf32>,
    %45 = vector.extract_strided_slice %4 {offsets = [0, 8], sizes = [8, 8], strides = [1, 1]} : vector<8x32xbf16> to vector<8x8xbf16>
    %46 = vector.extract_strided_slice %6 {offsets = [0, 8], sizes = [8, 8], strides = [1, 1]} : vector<8x32xbf16> to vector<8x8xbf16>
    %47 = vector.extract_strided_slice %8 {offsets = [0, 8], sizes = [8, 8], strides = [1, 1]} : vector<8x32xbf16> to vector<8x8xbf16>
    %cst_30 = arith.constant dense<0.000000e+00> : vector<8x8xf32>
    %48 = tpu.matmul %45, %46, %cst_30 {dimension_numbers = #tpu.dot_dimension_numbers<[1], [1], [0], [0], [0, 0, 1, 0], [], []>} : vector<8x8xbf16>, vector<8x8xbf16>, vector<8x8xf32> -> vector<8x8xf32>
    %c1 = arith.constant 1 : index
    %c0_31 = arith.constant 0 : index
    %c0_32 = arith.constant 0 : index
    %49 = vector.load %arg7[%c1, %c0_31, %c0_32] : memref<4x8x1xf32, #tpu.memory_space<vmem>>, vector<1x8x1xf32>
    %50 = vector.shape_cast %49 : vector<1x8x1xf32> to vector<8x1xf32>
    %cst_33 = arith.constant dense<0xFF800000> : vector<8xf32>
    %51 = vector.multi_reduction <maximumf>, %48, %cst_33 [1] : vector<8x8xf32> to vector<8xf32>
    %52 = vector.shape_cast %51 : vector<8xf32> to vector<8x1xf32>
    %53 = arith.maximumf %50, %52 : vector<8x1xf32>
    %54 = arith.subf %50, %53 : vector<8x1xf32>
    %55 = math.exp %54 : vector<8x1xf32>
    %56 = vector.broadcast %53 : vector<8x1xf32> to vector<8x8xf32>
    %57 = arith.subf %48, %56 : vector<8x8xf32>
    %58 = math.exp %57 : vector<8x8xf32>
    %c1_34 = arith.constant 1 : index
    %c0_35 = arith.constant 0 : index
    %c0_36 = arith.constant 0 : index
    %59 = vector.load %arg8[%c1_34, %c0_35, %c0_36] : memref<4x8x1xf32, #tpu.memory_space<vmem>>, vector<1x8x1xf32>
    %60 = vector.shape_cast %59 : vector<1x8x1xf32> to vector<8x1xf32>
    %61 = arith.mulf %55, %60 : vector<8x1xf32>
    %cst_37 = arith.constant dense<0.000000e+00> : vector<8xf32>
    %62 = vector.multi_reduction <add>, %58, %cst_37 [1] : vector<8x8xf32> to vector<8xf32>
    %63 = vector.shape_cast %62 : vector<8xf32> to vector<8x1xf32>
    %64 = arith.addf %61, %63 : vector<8x1xf32>
    %c1_38 = arith.constant 1 : index
    %c0_39 = arith.constant 0 : index
    %c0_40 = arith.constant 0 : index
    %65 = vector.load %arg8[%c1_38, %c0_39, %c0_40] : memref<4x8x1xf32, #tpu.memory_space<vmem>>, vector<1x8x1xf32>
    %66 = vector.shape_cast %65 : vector<1x8x1xf32> to vector<8x1xf32>
    %67 = vector.shape_cast %64 : vector<8x1xf32> to vector<1x8x1xf32>
    tpu.vector_store %arg8[%c1_38, %c0_39, %c0_40], %67 {strides = array<i32>} : memref<4x8x1xf32, #tpu.memory_space<vmem>>, vector<1x8x1xf32>,
    %c1_41 = arith.constant 1 : index
    %c0_42 = arith.constant 0 : index
    %c0_43 = arith.constant 0 : index
    %68 = vector.load %arg9[%c1_41, %c0_42, %c0_43] : memref<4x8x8xf32, #tpu.memory_space<vmem>>, vector<1x8x8xf32>
    %69 = vector.shape_cast %68 : vector<1x8x8xf32> to vector<8x8xf32>
    %70 = vector.broadcast %55 : vector<8x1xf32> to vector<8x8xf32>
    %71 = arith.mulf %70, %69 : vector<8x8xf32>
    %72 = arith.truncf %58 : vector<8x8xf32> to vector<8x8xbf16>
    %cst_44 = arith.constant dense<0.000000e+00> : vector<8x8xf32>
    %73 = tpu.matmul %72, %47, %cst_44 {dimension_numbers = #tpu.dot_dimension_numbers<[1], [0], [0], [1], [0, 0, 1, 1], [], []>} : vector<8x8xbf16>, vector<8x8xbf16>, vector<8x8xf32> -> vector<8x8xf32>
    %74 = arith.addf %71, %73 : vector<8x8xf32>
    %c1_45 = arith.constant 1 : index
    %c0_46 = arith.constant 0 : index
    %c0_47 = arith.constant 0 : index
    %75 = vector.load %arg9[%c1_45, %c0_46, %c0_47] : memref<4x8x8xf32, #tpu.memory_space<vmem>>, vector<1x8x8xf32>
    %76 = vector.shape_cast %75 : vector<1x8x8xf32> to vector<8x8xf32>
    %77 = vector.shape_cast %74 : vector<8x8xf32> to vector<1x8x8xf32>
    tpu.vector_store %arg9[%c1_45, %c0_46, %c0_47], %77 {strides = array<i32>} : memref<4x8x8xf32, #tpu.memory_space<vmem>>, vector<1x8x8xf32>,
    %c1_48 = arith.constant 1 : index
    %c0_49 = arith.constant 0 : index
    %c0_50 = arith.constant 0 : index
    %78 = vector.load %arg7[%c1_48, %c0_49, %c0_50] : memref<4x8x1xf32, #tpu.memory_space<vmem>>, vector<1x8x1xf32>
    %79 = vector.shape_cast %78 : vector<1x8x1xf32> to vector<8x1xf32>
    %80 = vector.shape_cast %53 : vector<8x1xf32> to vector<1x8x1xf32>
    tpu.vector_store %arg7[%c1_48, %c0_49, %c0_50], %80 {strides = array<i32>} : memref<4x8x1xf32, #tpu.memory_space<vmem>>, vector<1x8x1xf32>,
    %81 = vector.extract_strided_slice %4 {offsets = [0, 16], sizes = [8, 8], strides = [1, 1]} : vector<8x32xbf16> to vector<8x8xbf16>
    %82 = vector.extract_strided_slice %6 {offsets = [0, 16], sizes = [8, 8], strides = [1, 1]} : vector<8x32xbf16> to vector<8x8xbf16>
    %83 = vector.extract_strided_slice %8 {offsets = [0, 16], sizes = [8, 8], strides = [1, 1]} : vector<8x32xbf16> to vector<8x8xbf16>
    %cst_51 = arith.constant dense<0.000000e+00> : vector<8x8xf32>
    %84 = tpu.matmul %81, %82, %cst_51 {dimension_numbers = #tpu.dot_dimension_numbers<[1], [1], [0], [0], [0, 0, 1, 0], [], []>} : vector<8x8xbf16>, vector<8x8xbf16>, vector<8x8xf32> -> vector<8x8xf32>
    %c2 = arith.constant 2 : index
    %c0_52 = arith.constant 0 : index
    %c0_53 = arith.constant 0 : index
    %85 = vector.load %arg7[%c2, %c0_52, %c0_53] : memref<4x8x1xf32, #tpu.memory_space<vmem>>, vector<1x8x1xf32>
    %86 = vector.shape_cast %85 : vector<1x8x1xf32> to vector<8x1xf32>
    %cst_54 = arith.constant dense<0xFF800000> : vector<8xf32>
    %87 = vector.multi_reduction <maximumf>, %84, %cst_54 [1] : vector<8x8xf32> to vector<8xf32>
    %88 = vector.shape_cast %87 : vector<8xf32> to vector<8x1xf32>
    %89 = arith.maximumf %86, %88 : vector<8x1xf32>
    %90 = arith.subf %86, %89 : vector<8x1xf32>
    %91 = math.exp %90 : vector<8x1xf32>
    %92 = vector.broadcast %89 : vector<8x1xf32> to vector<8x8xf32>
    %93 = arith.subf %84, %92 : vector<8x8xf32>
    %94 = math.exp %93 : vector<8x8xf32>
    %c2_55 = arith.constant 2 : index
    %c0_56 = arith.constant 0 : index
    %c0_57 = arith.constant 0 : index
    %95 = vector.load %arg8[%c2_55, %c0_56, %c0_57] : memref<4x8x1xf32, #tpu.memory_space<vmem>>, vector<1x8x1xf32>
    %96 = vector.shape_cast %95 : vector<1x8x1xf32> to vector<8x1xf32>
    %97 = arith.mulf %91, %96 : vector<8x1xf32>
    %cst_58 = arith.constant dense<0.000000e+00> : vector<8xf32>
    %98 = vector.multi_reduction <add>, %94, %cst_58 [1] : vector<8x8xf32> to vector<8xf32>
    %99 = vector.shape_cast %98 : vector<8xf32> to vector<8x1xf32>
    %100 = arith.addf %97, %99 : vector<8x1xf32>
    %c2_59 = arith.constant 2 : index
    %c0_60 = arith.constant 0 : index
    %c0_61 = arith.constant 0 : index
    %101 = vector.load %arg8[%c2_59, %c0_60, %c0_61] : memref<4x8x1xf32, #tpu.memory_space<vmem>>, vector<1x8x1xf32>
    %102 = vector.shape_cast %101 : vector<1x8x1xf32> to vector<8x1xf32>
    %103 = vector.shape_cast %100 : vector<8x1xf32> to vector<1x8x1xf32>
    tpu.vector_store %arg8[%c2_59, %c0_60, %c0_61], %103 {strides = array<i32>} : memref<4x8x1xf32, #tpu.memory_space<vmem>>, vector<1x8x1xf32>,
    %c2_62 = arith.constant 2 : index
    %c0_63 = arith.constant 0 : index
    %c0_64 = arith.constant 0 : index
    %104 = vector.load %arg9[%c2_62, %c0_63, %c0_64] : memref<4x8x8xf32, #tpu.memory_space<vmem>>, vector<1x8x8xf32>
    %105 = vector.shape_cast %104 : vector<1x8x8xf32> to vector<8x8xf32>
    %106 = vector.broadcast %91 : vector<8x1xf32> to vector<8x8xf32>
    %107 = arith.mulf %106, %105 : vector<8x8xf32>
    %108 = arith.truncf %94 : vector<8x8xf32> to vector<8x8xbf16>
    %cst_65 = arith.constant dense<0.000000e+00> : vector<8x8xf32>
    %109 = tpu.matmul %108, %83, %cst_65 {dimension_numbers = #tpu.dot_dimension_numbers<[1], [0], [0], [1], [0, 0, 1, 1], [], []>} : vector<8x8xbf16>, vector<8x8xbf16>, vector<8x8xf32> -> vector<8x8xf32>
    %110 = arith.addf %107, %109 : vector<8x8xf32>
    %c2_66 = arith.constant 2 : index
    %c0_67 = arith.constant 0 : index
    %c0_68 = arith.constant 0 : index
    %111 = vector.load %arg9[%c2_66, %c0_67, %c0_68] : memref<4x8x8xf32, #tpu.memory_space<vmem>>, vector<1x8x8xf32>
    %112 = vector.shape_cast %111 : vector<1x8x8xf32> to vector<8x8xf32>
    %113 = vector.shape_cast %110 : vector<8x8xf32> to vector<1x8x8xf32>
    tpu.vector_store %arg9[%c2_66, %c0_67, %c0_68], %113 {strides = array<i32>} : memref<4x8x8xf32, #tpu.memory_space<vmem>>, vector<1x8x8xf32>,
    %c2_69 = arith.constant 2 : index
    %c0_70 = arith.constant 0 : index
    %c0_71 = arith.constant 0 : index
    %114 = vector.load %arg7[%c2_69, %c0_70, %c0_71] : memref<4x8x1xf32, #tpu.memory_space<vmem>>, vector<1x8x1xf32>
    %115 = vector.shape_cast %114 : vector<1x8x1xf32> to vector<8x1xf32>
    %116 = vector.shape_cast %89 : vector<8x1xf32> to vector<1x8x1xf32>
    tpu.vector_store %arg7[%c2_69, %c0_70, %c0_71], %116 {strides = array<i32>} : memref<4x8x1xf32, #tpu.memory_space<vmem>>, vector<1x8x1xf32>,
    %117 = vector.extract_strided_slice %4 {offsets = [0, 24], sizes = [8, 8], strides = [1, 1]} : vector<8x32xbf16> to vector<8x8xbf16>
    %118 = vector.extract_strided_slice %6 {offsets = [0, 24], sizes = [8, 8], strides = [1, 1]} : vector<8x32xbf16> to vector<8x8xbf16>
    %119 = vector.extract_strided_slice %8 {offsets = [0, 24], sizes = [8, 8], strides = [1, 1]} : vector<8x32xbf16> to vector<8x8xbf16>
    %cst_72 = arith.constant dense<0.000000e+00> : vector<8x8xf32>
    %120 = tpu.matmul %117, %118, %cst_72 {dimension_numbers = #tpu.dot_dimension_numbers<[1], [1], [0], [0], [0, 0, 1, 0], [], []>} : vector<8x8xbf16>, vector<8x8xbf16>, vector<8x8xf32> -> vector<8x8xf32>
    %c3 = arith.constant 3 : index
    %c0_73 = arith.constant 0 : index
    %c0_74 = arith.constant 0 : index
    %121 = vector.load %arg7[%c3, %c0_73, %c0_74] : memref<4x8x1xf32, #tpu.memory_space<vmem>>, vector<1x8x1xf32>
    %122 = vector.shape_cast %121 : vector<1x8x1xf32> to vector<8x1xf32>
    %cst_75 = arith.constant dense<0xFF800000> : vector<8xf32>
    %123 = vector.multi_reduction <maximumf>, %120, %cst_75 [1] : vector<8x8xf32> to vector<8xf32>
    %124 = vector.shape_cast %123 : vector<8xf32> to vector<8x1xf32>
    %125 = arith.maximumf %122, %124 : vector<8x1xf32>
    %126 = arith.subf %122, %125 : vector<8x1xf32>
    %127 = math.exp %126 : vector<8x1xf32>
    %128 = vector.broadcast %125 : vector<8x1xf32> to vector<8x8xf32>
    %129 = arith.subf %120, %128 : vector<8x8xf32>
    %130 = math.exp %129 : vector<8x8xf32>
    %c3_76 = arith.constant 3 : index
    %c0_77 = arith.constant 0 : index
    %c0_78 = arith.constant 0 : index
    %131 = vector.load %arg8[%c3_76, %c0_77, %c0_78] : memref<4x8x1xf32, #tpu.memory_space<vmem>>, vector<1x8x1xf32>
    %132 = vector.shape_cast %131 : vector<1x8x1xf32> to vector<8x1xf32>
    %133 = arith.mulf %127, %132 : vector<8x1xf32>
    %cst_79 = arith.constant dense<0.000000e+00> : vector<8xf32>
    %134 = vector.multi_reduction <add>, %130, %cst_79 [1] : vector<8x8xf32> to vector<8xf32>
    %135 = vector.shape_cast %134 : vector<8xf32> to vector<8x1xf32>
    %136 = arith.addf %133, %135 : vector<8x1xf32>
    %c3_80 = arith.constant 3 : index
    %c0_81 = arith.constant 0 : index
    %c0_82 = arith.constant 0 : index
    %137 = vector.load %arg8[%c3_80, %c0_81, %c0_82] : memref<4x8x1xf32, #tpu.memory_space<vmem>>, vector<1x8x1xf32>
    %138 = vector.shape_cast %137 : vector<1x8x1xf32> to vector<8x1xf32>
    %139 = vector.shape_cast %136 : vector<8x1xf32> to vector<1x8x1xf32>
    tpu.vector_store %arg8[%c3_80, %c0_81, %c0_82], %139 {strides = array<i32>} : memref<4x8x1xf32, #tpu.memory_space<vmem>>, vector<1x8x1xf32>,
    %c3_83 = arith.constant 3 : index
    %c0_84 = arith.constant 0 : index
    %c0_85 = arith.constant 0 : index
    %140 = vector.load %arg9[%c3_83, %c0_84, %c0_85] : memref<4x8x8xf32, #tpu.memory_space<vmem>>, vector<1x8x8xf32>
    %141 = vector.shape_cast %140 : vector<1x8x8xf32> to vector<8x8xf32>
    %142 = vector.broadcast %127 : vector<8x1xf32> to vector<8x8xf32>
    %143 = arith.mulf %142, %141 : vector<8x8xf32>
    %144 = arith.truncf %130 : vector<8x8xf32> to vector<8x8xbf16>
    %cst_86 = arith.constant dense<0.000000e+00> : vector<8x8xf32>
    %145 = tpu.matmul %144, %119, %cst_86 {dimension_numbers = #tpu.dot_dimension_numbers<[1], [0], [0], [1], [0, 0, 1, 1], [], []>} : vector<8x8xbf16>, vector<8x8xbf16>, vector<8x8xf32> -> vector<8x8xf32>
    %146 = arith.addf %143, %145 : vector<8x8xf32>
    %c3_87 = arith.constant 3 : index
    %c0_88 = arith.constant 0 : index
    %c0_89 = arith.constant 0 : index
    %147 = vector.load %arg9[%c3_87, %c0_88, %c0_89] : memref<4x8x8xf32, #tpu.memory_space<vmem>>, vector<1x8x8xf32>
    %148 = vector.shape_cast %147 : vector<1x8x8xf32> to vector<8x8xf32>
    %149 = vector.shape_cast %146 : vector<8x8xf32> to vector<1x8x8xf32>
    tpu.vector_store %arg9[%c3_87, %c0_88, %c0_89], %149 {strides = array<i32>} : memref<4x8x8xf32, #tpu.memory_space<vmem>>, vector<1x8x8xf32>,
    %c3_90 = arith.constant 3 : index
    %c0_91 = arith.constant 0 : index
    %c0_92 = arith.constant 0 : index
    %150 = vector.load %arg7[%c3_90, %c0_91, %c0_92] : memref<4x8x1xf32, #tpu.memory_space<vmem>>, vector<1x8x1xf32>
    %151 = vector.shape_cast %150 : vector<1x8x1xf32> to vector<8x1xf32>
    %152 = vector.shape_cast %125 : vector<8x1xf32> to vector<1x8x1xf32>
    tpu.vector_store %arg7[%c3_90, %c0_91, %c0_92], %152 {strides = array<i32>} : memref<4x8x1xf32, #tpu.memory_space<vmem>>, vector<1x8x1xf32>,
    %c0_i32_93 = arith.constant 0 : i32
    %153 = arith.cmpi eq, %arg2, %c0_i32_93 : i32
    %154 = arith.extui %153 : i1 to i32
    %c0_i32_94 = arith.constant 0 : i32
    %155 = arith.cmpi ne, %154, %c0_i32_94 : i32
    scf.if %155 {
      %c0_95 = arith.constant 0 : index
      %c0_96 = arith.constant 0 : index
      %c0_97 = arith.constant 0 : index
      %156 = vector.load %arg8[%c0_95, %c0_96, %c0_97] : memref<4x8x1xf32, #tpu.memory_space<vmem>>, vector<1x8x1xf32>
      %157 = vector.shape_cast %156 : vector<1x8x1xf32> to vector<8x1xf32>
      %158 = tpu.reciprocal %157 {approx = true} : vector<8x1xf32> -> vector<8x1xf32>
      %c0_98 = arith.constant 0 : index
      %c0_99 = arith.constant 0 : index
      %c0_100 = arith.constant 0 : index
      %159 = vector.load %arg9[%c0_98, %c0_99, %c0_100] : memref<4x8x8xf32, #tpu.memory_space<vmem>>, vector<1x8x8xf32>
      %160 = vector.shape_cast %159 : vector<1x8x8xf32> to vector<8x8xf32>
      %161 = vector.broadcast %158 : vector<8x1xf32> to vector<8x8xf32>
      %162 = arith.mulf %160, %161 : vector<8x8xf32>
      %163 = arith.truncf %162 : vector<8x8xf32> to vector<8x8xbf16>
      %c0_101 = arith.constant 0 : index
      %c0_102 = arith.constant 0 : index
      %c0_103 = arith.constant 0 : index
      %164 = vector.load %arg6[%c0_101, %c0_102, %c0_103] : memref<1x8x32xbf16, #tpu.memory_space<vmem>>, vector<1x8x8xbf16>
      %165 = vector.shape_cast %164 : vector<1x8x8xbf16> to vector<8x8xbf16>
      %166 = vector.shape_cast %163 : vector<8x8xbf16> to vector<1x8x8xbf16>
      tpu.vector_store %arg6[%c0_101, %c0_102, %c0_103], %166 {strides = array<i32>} : memref<1x8x32xbf16, #tpu.memory_space<vmem>>, vector<1x8x8xbf16>,
      %c1_104 = arith.constant 1 : index
      %c0_105 = arith.constant 0 : index
      %c0_106 = arith.constant 0 : index
      %167 = vector.load %arg8[%c1_104, %c0_105, %c0_106] : memref<4x8x1xf32, #tpu.memory_space<vmem>>, vector<1x8x1xf32>
      %168 = vector.shape_cast %167 : vector<1x8x1xf32> to vector<8x1xf32>
      %169 = tpu.reciprocal %168 {approx = true} : vector<8x1xf32> -> vector<8x1xf32>
      %c1_107 = arith.constant 1 : index
      %c0_108 = arith.constant 0 : index
      %c0_109 = arith.constant 0 : index
      %170 = vector.load %arg9[%c1_107, %c0_108, %c0_109] : memref<4x8x8xf32, #tpu.memory_space<vmem>>, vector<1x8x8xf32>
      %171 = vector.shape_cast %170 : vector<1x8x8xf32> to vector<8x8xf32>
      %172 = vector.broadcast %169 : vector<8x1xf32> to vector<8x8xf32>
      %173 = arith.mulf %171, %172 : vector<8x8xf32>
      %174 = arith.truncf %173 : vector<8x8xf32> to vector<8x8xbf16>
      %c0_110 = arith.constant 0 : index
      %c0_111 = arith.constant 0 : index
      %c8 = arith.constant 8 : index
      %175 = vector.load %arg6[%c0_110, %c0_111, %c8] : memref<1x8x32xbf16, #tpu.memory_space<vmem>>, vector<1x8x8xbf16>
      %176 = vector.shape_cast %175 : vector<1x8x8xbf16> to vector<8x8xbf16>
      %177 = vector.shape_cast %174 : vector<8x8xbf16> to vector<1x8x8xbf16>
      tpu.vector_store %arg6[%c0_110, %c0_111, %c8], %177 {strides = array<i32>} : memref<1x8x32xbf16, #tpu.memory_space<vmem>>, vector<1x8x8xbf16>,
      %c2_112 = arith.constant 2 : index
      %c0_113 = arith.constant 0 : index
      %c0_114 = arith.constant 0 : index
      %178 = vector.load %arg8[%c2_112, %c0_113, %c0_114] : memref<4x8x1xf32, #tpu.memory_space<vmem>>, vector<1x8x1xf32>
      %179 = vector.shape_cast %178 : vector<1x8x1xf32> to vector<8x1xf32>
      %180 = tpu.reciprocal %179 {approx = true} : vector<8x1xf32> -> vector<8x1xf32>
      %c2_115 = arith.constant 2 : index
      %c0_116 = arith.constant 0 : index
      %c0_117 = arith.constant 0 : index
      %181 = vector.load %arg9[%c2_115, %c0_116, %c0_117] : memref<4x8x8xf32, #tpu.memory_space<vmem>>, vector<1x8x8xf32>
      %182 = vector.shape_cast %181 : vector<1x8x8xf32> to vector<8x8xf32>
      %183 = vector.broadcast %180 : vector<8x1xf32> to vector<8x8xf32>
      %184 = arith.mulf %182, %183 : vector<8x8xf32>
      %185 = arith.truncf %184 : vector<8x8xf32> to vector<8x8xbf16>
      %c0_118 = arith.constant 0 : index
      %c0_119 = arith.constant 0 : index
      %c16 = arith.constant 16 : index
      %186 = vector.load %arg6[%c0_118, %c0_119, %c16] : memref<1x8x32xbf16, #tpu.memory_space<vmem>>, vector<1x8x8xbf16>
      %187 = vector.shape_cast %186 : vector<1x8x8xbf16> to vector<8x8xbf16>
      %188 = vector.shape_cast %185 : vector<8x8xbf16> to vector<1x8x8xbf16>
      tpu.vector_store %arg6[%c0_118, %c0_119, %c16], %188 {strides = array<i32>} : memref<1x8x32xbf16, #tpu.memory_space<vmem>>, vector<1x8x8xbf16>,
      %c3_120 = arith.constant 3 : index
      %c0_121 = arith.constant 0 : index
      %c0_122 = arith.constant 0 : index
      %189 = vector.load %arg8[%c3_120, %c0_121, %c0_122] : memref<4x8x1xf32, #tpu.memory_space<vmem>>, vector<1x8x1xf32>
      %190 = vector.shape_cast %189 : vector<1x8x1xf32> to vector<8x1xf32>
      %191 = tpu.reciprocal %190 {approx = true} : vector<8x1xf32> -> vector<8x1xf32>
      %c3_123 = arith.constant 3 : index
      %c0_124 = arith.constant 0 : index
      %c0_125 = arith.constant 0 : index
      %192 = vector.load %arg9[%c3_123, %c0_124, %c0_125] : memref<4x8x8xf32, #tpu.memory_space<vmem>>, vector<1x8x8xf32>
      %193 = vector.shape_cast %192 : vector<1x8x8xf32> to vector<8x8xf32>
      %194 = vector.broadcast %191 : vector<8x1xf32> to vector<8x8xf32>
      %195 = arith.mulf %193, %194 : vector<8x8xf32>
      %196 = arith.truncf %195 : vector<8x8xf32> to vector<8x8xbf16>
      %c0_126 = arith.constant 0 : index
      %c0_127 = arith.constant 0 : index
      %c24 = arith.constant 24 : index
      %197 = vector.load %arg6[%c0_126, %c0_127, %c24] : memref<1x8x32xbf16, #tpu.memory_space<vmem>>, vector<1x8x8xbf16>
      %198 = vector.shape_cast %197 : vector<1x8x8xbf16> to vector<8x8xbf16>
      %199 = vector.shape_cast %196 : vector<8x8xbf16> to vector<1x8x8xbf16>
      tpu.vector_store %arg6[%c0_126, %c0_127, %c24], %199 {strides = array<i32>} : memref<1x8x32xbf16, #tpu.memory_space<vmem>>, vector<1x8x8xbf16>,
    } else {
    }
    return
  }
  func.func @transform_0(%arg0: i32, %arg1: i32, %arg2: i32) -> (i32, i32, i32) {
    %c0_i32 = arith.constant 0 : i32
    %c0_i32_0 = arith.constant 0 : i32
    return %arg0, %arg1, %c0_i32 : i32, i32, i32
  }
  func.func @transform_1(%arg0: i32, %arg1: i32, %arg2: i32) -> (i32, i32, i32) {
    %c0_i32 = arith.constant 0 : i32
    %c0_i32_0 = arith.constant 0 : i32
    return %arg0, %arg2, %c0_i32 : i32, i32, i32
  }
  func.func @transform_2(%arg0: i32, %arg1: i32, %arg2: i32) -> (i32, i32, i32) {
    %c0_i32 = arith.constant 0 : i32
    %c0_i32_0 = arith.constant 0 : i32
    return %arg0, %arg2, %c0_i32 : i32, i32, i32
  }
  func.func @transform_3(%arg0: i32, %arg1: i32, %arg2: i32) -> (i32, i32, i32) {
    %c0_i32 = arith.constant 0 : i32
    %c0_i32_0 = arith.constant 0 : i32
    return %arg0, %arg1, %c0_i32 : i32, i32, i32
  }
}

module attributes {stable_mosaic.version = 11 : i64} {
  func.func @_linear_kernel(%arg0: i32, %arg1: i32, %arg2: i32, %arg3: memref<16x32xbf16, #tpu.memory_space<vmem>>, %arg4: memref<32x32xbf16, #tpu.memory_space<vmem>>, %arg5: memref<1x32xf32, #tpu.memory_space<vmem>>, %arg6: memref<16x32xf32, #tpu.memory_space<vmem>>, %arg7: memref<16x32xf32, #tpu.memory_space<vmem>>) attributes {dimension_semantics = [#tpu.dimension_semantics<parallel>, #tpu.dimension_semantics<parallel>, #tpu.dimension_semantics<arbitrary>], iteration_bounds = array<i64: 1, 1, 1>, scalar_prefetch = 0 : i64, scratch_operands = 1 : i64, tpu.core_type = #tpu.core_type<tc>, window_params = [{transform_indices = @transform_0, window_bounds = array<i64: 16, 32>}, {transform_indices = @transform_1, window_bounds = array<i64: 32, 32>}, {transform_indices = @transform_2, window_bounds = array<i64: 1, 32>}, {transform_indices = @transform_3, window_bounds = array<i64: 16, 32>}]} {
    %c0_i32 = arith.constant 0 : i32
    %0 = arith.cmpi eq, %arg2, %c0_i32 : i32
    %1 = arith.extui %0 : i1 to i32
    %c0_i32_0 = arith.constant 0 : i32
    %2 = arith.cmpi ne, %1, %c0_i32_0 : i32
    scf.if %2 {
      %cst_10 = arith.constant 0.000000e+00 : f32
      %12 = vector.broadcast %cst_10 : f32 to vector<16x32xf32>
      %c0_11 = arith.constant 0 : index
      %c0_12 = arith.constant 0 : index
      %13 = vector.load %arg7[%c0_11, %c0_12] : memref<16x32xf32, #tpu.memory_space<vmem>>, vector<16x32xf32>
      tpu.vector_store %arg7[%c0_11, %c0_12], %12 {strides = array<i32>} : memref<16x32xf32, #tpu.memory_space<vmem>>, vector<16x32xf32>,
    } else {
    }
    %c0 = arith.constant 0 : index
    %c0_1 = arith.constant 0 : index
    %3 = vector.load %arg7[%c0, %c0_1] : memref<16x32xf32, #tpu.memory_space<vmem>>, vector<16x32xf32>
    %c0_2 = arith.constant 0 : index
    %c0_3 = arith.constant 0 : index
    %4 = vector.load %arg3[%c0_2, %c0_3] : memref<16x32xbf16, #tpu.memory_space<vmem>>, vector<16x32xbf16>
    %c0_4 = arith.constant 0 : index
    %c0_5 = arith.constant 0 : index
    %5 = vector.load %arg4[%c0_4, %c0_5] : memref<32x32xbf16, #tpu.memory_space<vmem>>, vector<32x32xbf16>
    %cst = arith.constant dense<0.000000e+00> : vector<16x32xf32>
    %6 = tpu.matmul %4, %5, %cst {dimension_numbers = #tpu.dot_dimension_numbers<[1], [0], [0], [1], [0, 0, 1, 1], [], []>} : vector<16x32xbf16>, vector<32x32xbf16>, vector<16x32xf32> -> vector<16x32xf32>
    %7 = arith.addf %3, %6 : vector<16x32xf32>
    %c0_6 = arith.constant 0 : index
    %c0_7 = arith.constant 0 : index
    %8 = vector.load %arg7[%c0_6, %c0_7] : memref<16x32xf32, #tpu.memory_space<vmem>>, vector<16x32xf32>
    tpu.vector_store %arg7[%c0_6, %c0_7], %7 {strides = array<i32>} : memref<16x32xf32, #tpu.memory_space<vmem>>, vector<16x32xf32>,
    %c0_i32_8 = arith.constant 0 : i32
    %9 = arith.cmpi eq, %arg2, %c0_i32_8 : i32
    %10 = arith.extui %9 : i1 to i32
    %c0_i32_9 = arith.constant 0 : i32
    %11 = arith.cmpi ne, %10, %c0_i32_9 : i32
    scf.if %11 {
      %c0_10 = arith.constant 0 : index
      %c0_11 = arith.constant 0 : index
      %12 = vector.load %arg7[%c0_10, %c0_11] : memref<16x32xf32, #tpu.memory_space<vmem>>, vector<16x32xf32>
      %c0_12 = arith.constant 0 : index
      %c0_13 = arith.constant 0 : index
      %13 = vector.load %arg5[%c0_12, %c0_13] : memref<1x32xf32, #tpu.memory_space<vmem>>, vector<1x32xf32>
      %14 = vector.broadcast %13 : vector<1x32xf32> to vector<16x32xf32>
      %15 = arith.addf %12, %14 : vector<16x32xf32>
      %c0_14 = arith.constant 0 : index
      %c0_15 = arith.constant 0 : index
      %16 = vector.load %arg6[%c0_14, %c0_15] : memref<16x32xf32, #tpu.memory_space<vmem>>, vector<16x32xf32>
      tpu.vector_store %arg6[%c0_14, %c0_15], %15 {strides = array<i32>} : memref<16x32xf32, #tpu.memory_space<vmem>>, vector<16x32xf32>,
    } else {
    }
    return
  }
  func.func @transform_0(%arg0: i32, %arg1: i32, %arg2: i32) -> (i32, i32) {
    %c0_i32 = arith.constant 0 : i32
    return %arg0, %arg2 : i32, i32
  }
  func.func @transform_1(%arg0: i32, %arg1: i32, %arg2: i32) -> (i32, i32) {
    %c0_i32 = arith.constant 0 : i32
    return %arg2, %arg1 : i32, i32
  }
  func.func @transform_2(%arg0: i32, %arg1: i32, %arg2: i32) -> (i32, i32) {
    %c0_i32 = arith.constant 0 : i32
    %c0_i32_0 = arith.constant 0 : i32
    return %c0_i32, %arg1 : i32, i32
  }
  func.func @transform_3(%arg0: i32, %arg1: i32, %arg2: i32) -> (i32, i32) {
    %c0_i32 = arith.constant 0 : i32
    return %arg0, %arg1 : i32, i32
  }
}

</mosaic_0001>

<bundles_post_ra>
// kernel: multi_head_attention.5
= control target key start
LH: loop header
LB: loop body
LE: loop exit
PB: predicated region body
PF: predicated region fallthrough
CT: control target
= control target key end

     0   :  { %vm19_vm0 = vcmask 261120   ;;  %v150_v0 = vmov 0.0   ;;  %vm151_vm1 = vmmov 0   ;;  %vm118_vm2 = vcmask 257024   ;;  %s195_s1 = inlined_call_operand.vmem [shape: bf16[32,32], index: 1, kind: input, shape index: {}]   ;;  %s196_s0 = inlined_call_operand.vmem [shape: bf16[16,32], index: 0, kind: input, shape index: {}]   ;;  %s197_s2 = inlined_call_operand.vmem [shape: f32[1,32], index: 2, kind: input, shape index: {}]   ;;  %s198_s3 = inlined_call_operand.vmem [shape: bf16[16,32], index: 3, kind: output, shape index: {}]  }
   0x1   :  { %137 = vmatprep.subr.bf16.mxu0 %v150_v0  ;;  %v147_v1 = vld [vmem:[%s195_s1 + $0x8] sm:$0xff]   ;;  %141 = vmatprep.mubr.msk.bf16.mxu0 %vm151_vm1, %v150_v0  ;;  %20 = vst.msk [vmem:[#allocation2] sm:$0xff] %vm19_vm0, %v150_v0  ;;  %21 = vst.msk [vmem:[#allocation2 + $0x8] sm:$0xff] %vm19_vm0, %v150_v0  ;;  %v148_v2 = vld [vmem:[%s195_s1] sm:$0xff]  }
   0x2   :  { %138 = vmatpush3.bf16.msra.mxu0 %v147_v1  ;;  %v149_v3 = vld [vmem:[%s196_s0] sm:$0xff]  }
   0x3   :  { %139 = vmatprep.subr.bf16.mxu0 %v150_v0  ;;  %v129_v12 = vld [vmem:[%s197_s2] ss:$0 sm:$0xff] }
   0x6   :  { %140 = vmatpush3.bf16.msra.mxu0 %v148_v2 }
   0x8   :  { %v22_v4 = vld [vmem:[#allocation2] sm:$0xff]  ;;  %v23_v8 = vld [vmem:[#allocation2 + $0x8] sm:$0xff] }
   0x9   :  { %142 = vmatmul.mubr.msk.bf16.vlgmr.msra.gmra.mxu0 %vm19_vm0, %v149_v3 }
  0xc9   :  { %v85_v5 = vpop.f32.mrf.mxu0 }
  0xca   :  { %v92_v6 = vadd.f32 %v85_v5, %v22_v4 }
  0xcb   :  { %v143_v7 = vpop.f32.mrf.mxu0 }
  0xcc   :  { %94 = vst.msk [vmem:[#allocation2] sm:$0xff] %vm19_vm0, %v92_v6 }
  0xcd   :  { %v88_v9 = vpop.f32.mrf.mxu0 }
  0xce   :  { %v93_v10 = vadd.f32 %v88_v9, %v23_v8 }
  0xcf   :  { %v144_v11 = vpop.f32.mrf.mxu0 }
  0xd0   :  { %95 = vst.msk [vmem:[#allocation2 + $0x8] sm:$0xff] %vm19_vm0, %v93_v10 }
  0xd3   :  { %v99_v13 = vld [vmem:[#allocation2] sm:$0xff] }
  0xd4   :  { %v108_v14 = vadd.f32 %v129_v12, %v99_v13 }
  0xd6   :  { %v132_v15 = vpack.c.bf16 %v108_v14, %v108_v14 }
  0xd7   :  { %v100_v16 = vld [vmem:[#allocation2 + $0x8] sm:$0xff] }
  0xd8   :  { %119 = vst.msk [vmem:[%s198_s3] sm:$0xf] %vm118_vm2, %v132_v15  ;;  %v109_v17 = vadd.f32 %v129_v12, %v100_v16 }
  0xda   :  { %v133_v18 = vpack.c.bf16 %v109_v17, %v109_v17 }
  0xdc   :  { %120 = vst.msk [vmem:[%s198_s3 + $0x4] sm:$0xf] %vm118_vm2, %v133_v18 }

// kernel: multi_head_attention.9
= control target key start
LH: loop header
LB: loop body
LE: loop exit
PB: predicated region body
PF: predicated region fallthrough
CT: control target
= control target key end

     0   :  { %v175_v1 = vmov 0.0   ;;  %vm176_vm0 = vmmov 0   ;;  %vm20_vm1 = vcmask 261120   ;;  %s222_s0 = inlined_call_operand.vmem [shape: bf16[16,32], index: 0, kind: input, shape index: {}]   ;;  %s223_s1 = inlined_call_operand.vmem [shape: bf16[32,32], index: 1, kind: input, shape index: {}]   ;;  %s224_s2 = inlined_call_operand.vmem [shape: f32[1,32], index: 2, kind: input, shape index: {}]   ;;  %s225_s3 = inlined_call_operand.hbm [shape: f32[16,32], index: 3, kind: output, shape index: {}]  }
   0x1   :  { %v150_v0 = vld [vmem:[%s223_s1 + $0x8] sm:$0xff]   ;;  %137 = vmatprep.subr.bf16.mxu0 %v175_v1  ;;  %v151_v2 = vld [vmem:[%s223_s1] sm:$0xff]   ;;  %141 = vmatprep.mubr.msk.bf16.mxu0 %vm176_vm0, %v175_v1  ;;  %21 = vst.msk [vmem:[#allocation2] sm:$0xff] %vm20_vm1, %v175_v1  ;;  %22 = vst.msk [vmem:[#allocation2 + $0x8] sm:$0xff] %vm20_vm1, %v175_v1 }
   0x2   :  { %138 = vmatpush3.bf16.msra.mxu0 %v150_v0 }
   0x3   :  { %139 = vmatprep.subr.bf16.mxu0 %v175_v1 }
   0x4   :  { %8 = vsyncpa [#allocation4], 0  ;;  %v152_v3 = vld [vmem:[%s222_s0] sm:$0xff]   ;;  %s177_s0 = smov [#allocation3]  }
   0x5   :  { %v133_v12 = vld [vmem:[%s224_s2] ss:$0 sm:$0xff]  ;;  %s118_s19 = sshll.u32 %s177_s0, 4  ;;  %s119_s19 = int_to_ptr.vmem [resolvable:$true] %s118_s19 }
   0x6   :  { %140 = vmatpush3.bf16.msra.mxu0 %v151_v2  ;;  %s153_s20 = scalar_lea.vmem %s119_s19, 256  ;;  %p158_p1 = scmp.lt.s32.totalorder %s119_s19, %s119_s19 }
   0x7   :  { %p154_p0 = scmp.ne.s32.totalorder %s119_s19, %s153_s20  ;;  %p159_p2 = scmp.lt.s32.totalorder %s153_s20, %s153_s20 }
   0x8   :  { %v23_v4 = vld [vmem:[#allocation2] sm:$0xff]  ;;  %v24_v8 = vld [vmem:[#allocation2 + $0x8] sm:$0xff] }
   0x9   :  { %142 = vmatmul.mubr.msk.bf16.vlgmr.msra.gmra.mxu0 %vm20_vm1, %v152_v3  ;;  %p160_p3 = por %p159_p2, %p158_p1 }
   0xb   :  { %p161_p4 = pnand %p160_p3, %p154_p0 }
  0xc9   :  { %v86_v5 = vpop.f32.mrf.mxu0 }
  0xca   :  { %v93_v6 = vadd.f32 %v86_v5, %v23_v4 }
  0xcb   :  { %v143_v7 = vpop.f32.mrf.mxu0 }
  0xcc   :  { %95 = vst.msk [vmem:[#allocation2] sm:$0xff] %vm20_vm1, %v93_v6 }
  0xcd   :  { %v89_v9 = vpop.f32.mrf.mxu0 }
  0xce   :  { %v94_v10 = vadd.f32 %v89_v9, %v24_v8 }
  0xcf   :  { %v144_v11 = vpop.f32.mrf.mxu0 }
  0xd0   :  { %96 = vst.msk [vmem:[#allocation2 + $0x8] sm:$0xff] %vm20_vm1, %v94_v10 }
  0xd3   :  { %v100_v13 = vld [vmem:[#allocation2] sm:$0xff] }
  0xd4   :  { %v109_v14 = vadd.f32 %v133_v12, %v100_v13 }
  0xd6   :  { %111 = vst.msk [vmem:[#allocation3] sm:$0xff] %vm20_vm1, %v109_v14 }
  0xd7   :  { %v101_v15 = vld [vmem:[#allocation2 + $0x8] sm:$0xff] }
  0xd8   :  { %v110_v16 = vadd.f32 %v133_v12, %v101_v15 }
  0xda   :  { %112 = vst.msk [vmem:[#allocation3 + $0x8] sm:$0xff] %vm20_vm1, %v110_v16 }
  0xdb   :  { %164 = shalt.err (!%p161_p4)
}
  0xdc   :  { %s178_s21 = smov 128   ;;  %s179_s2 = smov 8  }
  0xdd   :  { %124 = dma.vmem_to_hbm [thread:$0]  %s119_s19, 256, %s225_s3, [#allocation4], %s178_s21, %s178_s21, %s179_s2  }
  0xde   :  { %173 = dma.done.wait [#allocation4], 256  }
  0xdf   :  { %174 = vsyncadd [#allocation4], 4294967040 }
  0xe0   :  { %128 = vsyncpa [#allocation4], 1 }

// kernel: multi_head_attention.8
= control target key start
LH: loop header
LB: loop body
LE: loop exit
PB: predicated region body
PF: predicated region fallthrough
CT: control target
= control target key end

     0   :  { %s1209_s12 = smov 0   ;;  %s1211_s13 = smov 0   ;;  %s1383_s0 = inlined_call_operand.vmem [shape: bf16[2,8,32], index: 0, kind: input, shape index: {}]   ;;  %s1384_s1 = inlined_call_operand.vmem [shape: bf16[2,8,32], index: 1, kind: input, shape index: {}]   ;;  %s1385_s2 = inlined_call_operand.vmem [shape: bf16[2,8,32], index: 2, kind: input, shape index: {}]   ;;  %s1386_s3 = inlined_call_operand.vmem [shape: bf16[2,8,32], index: 3, kind: output, shape index: {}]  }
   0x1   :  { %s1213_s14 = smov 0  }
   0x2 LB: > { %s32_s15 = sadd.s32 1, %s1173_s13  ;;  %p1005_p0 = scmp.ge.s32.totalorder %s1177_s14, 1  ;;  %s1177_s14 = sphi %s1213_s14, %s13_s14   ;;  %s1173_s13 = sphi %s1211_s13, %s1388_s13   ;;  %s1169_s12 = sphi %s1209_s12, %s1387_s12  }
   0x3   : > { %p34_p1 = scmp.ge.s32.totalorder %s32_s15, 2  ;;  %p190_p2 = scmp.lt.s32.totalorder %s1177_s14, 3 }
   0x5   : > { %s1390_s15 = smov (%p34_p1, %s32_s15), 0  ;;  %p191_p3 = pnand %p1005_p0, %p190_p2 }
   0x6   : > { %p232_p4 = scmp.lt.s32.totalorder (!%p191_p3), %s1169_s12, 1  ;;  %s1183_s23 = smov (!%p191_p3), 120  }
   0x7   : > { %194 = sbr.rel (%p191_p3) target bundleno = 1409 (0x581), region = 32  ;;  %s1184_s24 = smov (!%p191_p3), 112  }
   0x8   : > { %s1185_s25 = smov (!%p191_p3), 104   ;;  %s1186_s5 = smov (!%p191_p3), 8  }
   0x9   : > { %s1187_s6 = smov (!%p191_p3), 16   ;;  %s1188_s7 = smov (!%p191_p3), 24  }
   0xc   : > { %vm274_vm0 = vcmask 64512   ;;  %v1179_v0 = vmov 0.0   ;;  %vm1180_vm1 = vmmov 0   ;;  %s1392_s12 = smov (!%p232_p4, %s1169_s12), 1  ;;  %vm265_vm2 = vcmask 7168  }
   0xd   : > { %1045 = vmatprep.subr.bf16.mxu0 %v1179_v0  ;;  %275 = vst.msk [vmem:[#allocation4] sm:$0xff] %vm274_vm0, %v1179_v0  ;;  %276 = vst.msk [vmem:[#allocation4 + $0x8] sm:$0xff] %vm274_vm0, %v1179_v0  ;;  %1047 = vmatprep.mubr.msk.bf16.mxu0 %vm1180_vm1, %v1179_v0  ;;  %s1241_s16 = sshll.u32 %s1392_s12, 2  ;;  %v1181_v4 = vmov -inf   ;;  %v1182_v10 = vmov 0   ;;  %vm364_vm3 = vcmask 1043456  }
   0xe   : > { %277 = vst.msk [vmem:[#allocation4 + $0x10] sm:$0xff] %vm274_vm0, %v1179_v0  ;;  %278 = vst.msk [vmem:[#allocation4 + $0x18] sm:$0xff] %vm274_vm0, %v1179_v0  ;;  %1051 = vmatprep.subr.bf16.mxu1 %v1179_v0  ;;  %1053 = vmatprep.mubr.msk.bf16.mxu1 %vm1180_vm1, %v1179_v0  ;;  %s245_s19 = scalar_lea.vmem %s1384_s1, %s1241_s16  ;;  %s238_s22 = scalar_lea.vmem %s1383_s0, %s1241_s16  ;;  %vm838_vm4 = vcmask 60416   ;;  %vm856_vm5 = vcmask 126016   ;;  %vm874_vm6 = vcmask 191616   ;;  %vm892_vm7 = vcmask 257216  }
   0xf   : > { %v280_v1 = vld [vmem:[%s245_s19] sm:$0xf]  ;;  %266 = vst.msk [vmem:[#allocation2] sm:$0xff] %vm265_vm2, %v1181_v4  ;;  %267 = vst.msk [vmem:[#allocation2 + $0x8] sm:$0xff] %vm265_vm2, %v1181_v4  ;;  %1127 = vset.pattern.permute.xlu0 %v1182_v10  ;;  %1128 = vset.pattern.permute.xlu1 %v1182_v10  ;;  %s252_s28 = scalar_lea.vmem %s1385_s2, %s1241_s16  ;;  %s1367_s4 = scalar_lea.vmem %s1386_s3, %s1241_s16 }
  0x10   : > { %v287_v2 = vsel %vm274_vm0, %v280_v1, 0  ;;  %v279_v3 = vld [vmem:[%s238_s22] sm:$0xf]  ;;  %268 = vst.msk [vmem:[#allocation2 + $0x10] sm:$0xff] %vm265_vm2, %v1181_v4  ;;  %269 = vst.msk [vmem:[#allocation2 + $0x18] sm:$0xff] %vm265_vm2, %v1181_v4  ;;  %v1013_v11 = vcombine.low %v280_v1, %v280_v1 }
  0x11   : > { %1046 = vmatpush3.bf16.xpose.msra.mxu0 %v287_v2  ;;  %270 = vst.msk [vmem:[#allocation3] sm:$0xff] %vm265_vm2, %v1179_v0  ;;  %271 = vst.msk [vmem:[#allocation3 + $0x8] sm:$0xff] %vm265_vm2, %v1179_v0  ;;  %v1012_v12 = vcombine.low %v279_v3, %v279_v3  ;;  %v1289_v17 = vld [vmem:[%s252_s28] sm:$0xf] }
  0x12   : > { %1063 = vmatprep.subr.bf16.mxu0 %v1179_v0  ;;  %272 = vst.msk [vmem:[#allocation3 + $0x10] sm:$0xff] %vm265_vm2, %v1179_v0  ;;  %273 = vst.msk [vmem:[#allocation3 + $0x18] sm:$0xff] %vm265_vm2, %v1179_v0  ;;  %419 = vrot.lane.b32.xlu1 %v1013_v11, %s1183_s23  ;;  %v366_v18 = vsel %vm364_vm3, %v1289_v17, 0  ;;  %v1015_v63 = vcombine.low %v1289_v17, %v1289_v17 }
  0x13   : > { %1052 = vmatpush3.bf16.msra.mxu1 %v366_v18 }
  0x14   : > { %1057 = vmatprep.subr.bf16.mxu1 %v1179_v0 }
  0x16   : > { %414 = vrot.lane.b32.xlu1 %v1012_v12, %s1183_s23  ;;  %v1275_v13 = vld [vmem:[#allocation2] sm:$0xff]  ;;  %v468_v52 = vld [vmem:[#allocation2 + $0x8] sm:$0xff] }
  0x17   : > { %v1319_v56 = vld [vmem:[#allocation2 + $0x10] sm:$0xff]  ;;  %v741_v60 = vld [vmem:[#allocation2 + $0x18] sm:$0xff] }
  0x18   : > { %1048 = vmatmul.mubr.msk.bf16.vlgmr.msra.gmra.mxu0 %vm274_vm0, %v279_v3 }
  0x19   : > { %1065 = vmatprep.mubr.msk.bf16.mxu0 %vm1180_vm1, %v1179_v0 }
  0x1a   : > { %557 = vrot.lane.b32.xlu1 %v1013_v11, %s1184_s24 }
  0x1e   : > { %555 = vrot.lane.b32.xlu1 %v1012_v12, %s1184_s24 }
  0x22   : > { %692 = vrot.lane.b32.xlu1 %v1013_v11, %s1185_s25 }
  0x26   : > { %690 = vrot.lane.b32.xlu1 %v1012_v12, %s1185_s25 }
  0x84   : > { %v420_v22 = vpop.permute.xlu1 %419 }
  0x85   : > { %v425_v25 = vsel %vm274_vm0, %v420_v22, 0 }
  0x88   : > { %v415_v23 = vpop.permute.xlu1 %414 }
  0x8c   : > { %v558_v27 = vpop.permute.xlu1 %557 }
  0x8d   : > { %v563_v29 = vsel %vm274_vm0, %v558_v27, 0 }
  0x90   : > { %v556_v28 = vpop.permute.xlu1 %555 }
  0x94   : > { %v693_v30 = vpop.permute.xlu1 %692 }
  0x95   : > { %v698_v31 = vsel %vm274_vm0, %v693_v30, 0 }
  0x98   : > { %v691_v32 = vpop.permute.xlu1 %690 }
  0xd8   : > { %v323_v5 = vpop.f32.mrf.mxu0 }
  0xd9   : > { %v330_v6 = vsel %vm274_vm0, %v323_v5, -inf }
  0xda   : > { %331 = vmax.xlane.f32.xlu0 %v330_v6  ;;  %v1049_v7 = vpop.f32.mrf.mxu0 }
  0xdc   : > { %v326_v8 = vpop.f32.mrf.mxu0 }
  0xde   : > { %v1050_v9 = vpop.f32.mrf.mxu0 }
 0x163   : > { %v332_v14 = vpop.xlane.xlu0 %331 }
 0x164   : > { %v1278_v15 = vmax.f32 %v1275_v13, %v332_v14 }
 0x166   : > { %v334_v16 = vsub.f32 %v1275_v13, %v1278_v15  ;;  %410 = vst.msk [vmem:[#allocation2] sm:$0xff] %vm265_vm2, %v1278_v15  ;;  %339 = vperm.xlu0 %1127, %v1278_v15  }
 0x1e1   : > { %v340_v19 = vpop.permute.xlu0 %339 }
 0x1e2   : > { %v342_v20 = vsub.f32 %v323_v5, %v340_v19 }
 0x1e4   : > { %v343_v21 = vmul.f32 1.442695, %v342_v20 }
 0x1e6   : > { %1131 = vpow2.f32 %v343_v21 }
 0x1f3   : > { %v1294_v24 = vpop.eup %1131 }
 0x1f4   : > { %v360_v26 = vpack.c.bf16 %v1294_v24, %v1294_v24  ;;  %v347_v2 = vsel %vm274_vm0, %v1294_v24, 0.0 }
 0x1f6   : > { %1054 = vmatmul.mubr.msk.bf16.vlgmr.msra.gmra.mxu1 %vm274_vm0, %v360_v26 }
 0x1f7   : > { %1058 = vmatpush3.bf16.xpose.msra.mxu1 %v425_v25  ;;  %1059 = vmatprep.mubr.msk.bf16.mxu1 %vm1180_vm1, %v1179_v0 }
 0x1f8   : > { %1069 = vmatprep.subr.bf16.mxu1 %v1179_v0 }
 0x1fe   : > { %1060 = vmatmul.mubr.msk.bf16.vlgmr.msra.gmra.mxu1 %vm274_vm0, %v415_v23 }
 0x1ff   : > { %1070 = vmatpush3.bf16.xpose.msra.mxu1 %v563_v29  ;;  %1071 = vmatprep.mubr.msk.bf16.mxu1 %vm1180_vm1, %v1179_v0 }
 0x200   : > { %1081 = vmatprep.subr.bf16.mxu1 %v1179_v0 }
 0x206   : > { %1072 = vmatmul.mubr.msk.bf16.vlgmr.msra.gmra.mxu1 %vm274_vm0, %v556_v28 }
 0x207   : > { %1082 = vmatpush3.bf16.xpose.msra.mxu1 %v698_v31  ;;  %1083 = vmatprep.mubr.msk.bf16.mxu1 %vm1180_vm1, %v1179_v0 }
 0x20e   : > { %1084 = vmatmul.mubr.msk.bf16.vlgmr.msra.gmra.mxu1 %vm274_vm0, %v691_v32  ;;  %v335_v32 = vmul.f32 1.442695, %v334_v16  ;;  %v485_v16 = vld [vmem:[#allocation3 + $0x8] sm:$0xff] }
 0x2b6   : > { %v1313_v33 = vpop.f32.mrf.mxu1 }
 0x2b8   : > { %v1055_v34 = vpop.f32.mrf.mxu1 }
 0x2ba   : > { %v405_v35 = vpop.f32.mrf.mxu1 }
 0x2bc   : > { %v1056_v36 = vpop.f32.mrf.mxu1 }
 0x2be   : > { %v461_v37 = vpop.f32.mrf.mxu1 }
 0x2bf   : > { %v469_v38 = vsel %vm274_vm0, %v461_v37, -inf }
 0x2c0   : > { %470 = vmax.xlane.f32.xlu1 %v469_v38  ;;  %v1061_v39 = vpop.f32.mrf.mxu1  ;;  %v345_v38 = vld [vmem:[#allocation3] sm:$0xff] }
 0x2c2   : > { %v464_v40 = vpop.f32.mrf.mxu1 }
 0x2c4   : > { %v1062_v41 = vpop.f32.mrf.mxu1 }
 0x2c6   : > { %v599_v42 = vpop.f32.mrf.mxu1 }
 0x2c7   : > { %v607_v43 = vsel %vm274_vm0, %v599_v42, -inf }
 0x2c8   : > { %608 = vmax.xlane.f32.xlu0 %v607_v43  ;;  %v1073_v44 = vpop.f32.mrf.mxu1 }
 0x2ca   : > { %v602_v45 = vpop.f32.mrf.mxu1 }
 0x2cb   : > { %v623_v45 = vld [vmem:[#allocation3 + $0x10] sm:$0xff] }
 0x2cc   : > { %v1074_v46 = vpop.f32.mrf.mxu1 }
 0x2ce   : > { %v734_v47 = vpop.f32.mrf.mxu1 }
 0x2cf   : > { %v742_v48 = vsel %vm274_vm0, %v734_v47, -inf }
 0x2d0   : > { %743 = vmax.xlane.f32.xlu1 %v742_v48  ;;  %v1085_v49 = vpop.f32.mrf.mxu1 }
 0x2d2   : > { %v737_v50 = vpop.f32.mrf.mxu1 }
 0x2d3   : > { %v758_v50 = vld [vmem:[#allocation3 + $0x18] sm:$0xff] }
 0x2d4   : > { %v1086_v51 = vpop.f32.mrf.mxu1 }
 0x349   : > { %v471_v53 = vpop.xlane.xlu1 %470 }
 0x34a   : > { %v472_v54 = vmax.f32 %v468_v52, %v471_v53 }
 0x34c   : > { %v473_v55 = vsub.f32 %v468_v52, %v472_v54  ;;  %554 = vst.msk [vmem:[#allocation2 + $0x8] sm:$0xff] %vm265_vm2, %v472_v54  ;;  %478 = vperm.xlu1 %1128, %v472_v54  }
 0x34e   : > { %v474_v23 = vmul.f32 1.442695, %v473_v55  ;;  %v353_v55 = vld [vmem:[#allocation4] sm:$0xff] }
 0x351   : > { %v609_v57 = vpop.xlane.xlu0 %608 }
 0x352   : > { %v1322_v58 = vmax.f32 %v1319_v56, %v609_v57 }
 0x354   : > { %v611_v59 = vsub.f32 %v1319_v56, %v1322_v58  ;;  %689 = vst.msk [vmem:[#allocation2 + $0x10] sm:$0xff] %vm265_vm2, %v1322_v58  ;;  %616 = vperm.xlu0 %1127, %v1322_v58  }
 0x356   : > { %v612_v35 = vmul.f32 1.442695, %v611_v59 }
 0x359   : > { %v744_v61 = vpop.xlane.xlu1 %743 }
 0x35a   : > { %v745_v62 = vmax.f32 %v741_v60, %v744_v61 }
 0x35c   : > { %v746_v1 = vsub.f32 %v741_v60, %v745_v62  ;;  %824 = vst.msk [vmem:[#allocation2 + $0x18] sm:$0xff] %vm265_vm2, %v745_v62  ;;  %751 = vperm.xlu1 %1128, %v745_v62  }
 0x35e   : > { %v747_v26 = vmul.f32 1.442695, %v746_v1 }
 0x360   : > { %504 = vrot.lane.b32.xlu1 %v1015_v63, %s1183_s23 }
 0x364   : > { %639 = vrot.lane.b32.xlu1 %v1015_v63, %s1184_s24 }
 0x368   : > { %774 = vrot.lane.b32.xlu1 %v1015_v63, %s1185_s25  ;;  %v493_v63 = vld [vmem:[#allocation4 + $0x8] sm:$0xff] }
 0x38c   : > { %348 = vadd.xlane.f32.xlu1 %v347_v2 }
 0x3c7   : > { %v479_v3 = vpop.permute.xlu1 %478 }
 0x3c8   : > { %v481_v4 = vsub.f32 %v461_v37, %v479_v3 }
 0x3ca   : > { %v482_v5 = vmul.f32 1.442695, %v481_v4 }
 0x3cc   : > { %1133 = vpow2.f32 %v482_v5 }
 0x3cf   : > { %v617_v6 = vpop.permute.xlu0 %616 }
 0x3d0   : > { %v619_v7 = vsub.f32 %v599_v42, %v617_v6  ;;  %v631_v6 = vld [vmem:[#allocation4 + $0x10] sm:$0xff] }
 0x3d2   : > { %v620_v8 = vmul.f32 1.442695, %v619_v7 }
 0x3d4   : > { %1135 = vpow2.f32 %v620_v8 }
 0x3d7   : > { %v752_v9 = vpop.permute.xlu1 %751 }
 0x3d8   : > { %v754_v10 = vsub.f32 %v734_v47, %v752_v9 }
 0x3d9   : > { %v1134_v11 = vpop.eup %1133 }
 0x3da   : > { %v755_v12 = vmul.f32 1.442695, %v754_v10  ;;  %v487_v14 = vsel %vm274_vm0, %v1134_v11, 0.0  ;;  %v500_v19 = vpack.c.bf16 %v1134_v11, %v1134_v11 }
 0x3db   : > { %488 = vadd.xlane.f32.xlu0 %v487_v14  ;;  %v505_v17 = vpop.permute.xlu1 %504 }
 0x3dc   : > { %1137 = vpow2.f32 %v755_v12  ;;  %v510_v18 = vsel %vm364_vm3, %v505_v17, 0 }
 0x3dd   : > { %1064 = vmatpush3.bf16.msra.mxu0 %v510_v18  ;;  %1139 = vpow2.f32 %v474_v23 }
 0x3de   : > { %1075 = vmatprep.subr.bf16.mxu0 %v1179_v0  ;;  %1141 = vpow2.f32 %v747_v26 }
 0x3df   : > { %v640_v20 = vpop.permute.xlu1 %639  ;;  %1143 = vpow2.f32 %v335_v32 }
 0x3e0   : > { %1066 = vmatmul.mubr.msk.bf16.vlgmr.msra.gmra.mxu0 %vm274_vm0, %v500_v19  ;;  %v645_v21 = vsel %vm364_vm3, %v640_v20, 0  ;;  %1145 = vpow2.f32 %v612_v35  ;;  %v766_v20 = vld [vmem:[#allocation4 + $0x18] sm:$0xff] }
 0x3e1   : > { %v1136_v22 = vpop.eup %1135  ;;  %1076 = vmatpush3.bf16.msra.mxu0 %v645_v21  ;;  %1077 = vmatprep.mubr.msk.bf16.mxu0 %vm1180_vm1, %v1179_v0 }
 0x3e2   : > { %v625_v24 = vsel %vm274_vm0, %v1136_v22, 0.0  ;;  %1087 = vmatprep.subr.bf16.mxu0 %v1179_v0  ;;  %v638_v27 = vpack.c.bf16 %v1136_v22, %v1136_v22 }
 0x3e3   : > { %626 = vadd.xlane.f32.xlu1 %v625_v24  ;;  %v775_v25 = vpop.permute.xlu1 %774 }
 0x3e4   : > { %v780_v28 = vsel %vm364_vm3, %v775_v25, 0 }
 0x3e8   : > { %1078 = vmatmul.mubr.msk.bf16.vlgmr.msra.gmra.mxu0 %vm274_vm0, %v638_v27 }
 0x3e9   : > { %v1138_v29 = vpop.eup %1137  ;;  %1088 = vmatpush3.bf16.msra.mxu0 %v780_v28  ;;  %1089 = vmatprep.mubr.msk.bf16.mxu0 %vm1180_vm1, %v1179_v0 }
 0x3ea   : > { %v760_v30 = vsel %vm274_vm0, %v1138_v29, 0.0  ;;  %v773_v31 = vpack.c.bf16 %v1138_v29, %v1138_v29  ;;  %v1140_v34 = vpop.eup %1139 }
 0x3eb   : > { %761 = vadd.xlane.f32.xlu0 %v760_v30  ;;  %v1142_v36 = vpop.eup %1141  ;;  %v486_v42 = vmul.f32 %v1140_v34, %v485_v16 }
 0x3ec   : > { %v1144_v37 = vpop.eup %1143  ;;  %v759_v51 = vmul.f32 %v1142_v36, %v758_v50 }
 0x3ed   : > { %v1146_v0 = vpop.eup %1145  ;;  %v346_v39 = vmul.f32 %v1144_v37, %v345_v38 }
 0x3ee   : > { %v624_v46 = vmul.f32 %v1146_v0, %v623_v45 }
 0x3f0   : > { %1090 = vmatmul.mubr.msk.bf16.vlgmr.msra.gmra.mxu0 %vm274_vm0, %v773_v31 }
 0x3f4   : > { %496 = vperm.xlu1 %1128, %v1140_v34  }
 0x3f8   : > { %769 = vperm.xlu1 %1128, %v1142_v36  }
 0x401   : > { %356 = vperm.xlu0 %1127, %v1144_v37  }
 0x405   : > { %634 = vperm.xlu0 %1127, %v1146_v0  }
 0x415   : > { %v349_v40 = vpop.xlane.xlu1 %348 }
 0x416   : > { %v350_v41 = vadd.f32 %v349_v40, %v346_v39 }
 0x418   : > { %352 = vst.msk [vmem:[#allocation3] sm:$0xff] %vm265_vm2, %v350_v41 }
 0x41f   : > { %v828_v13 = vld [vmem:[#allocation3] sm:$0xff] }
 0x420   : > { %1147 = vrcp.f32 %v828_v13 }
 0x42d   : > { %v1148_v15 = vpop.eup %1147 }
 0x42e   : > { %833 = vperm.xlu1 %1128, %v1148_v15  }
 0x464   : > { %v489_v43 = vpop.xlane.xlu0 %488 }
 0x465   : > { %v490_v44 = vadd.f32 %v489_v43, %v486_v42 }
 0x467   : > { %491 = vst.msk [vmem:[#allocation3 + $0x8] sm:$0xff] %vm265_vm2, %v490_v44 }
 0x46c   : > { %v627_v47 = vpop.xlane.xlu1 %626 }
 0x46d   : > { %v628_v48 = vadd.f32 %v627_v47, %v624_v46 }
 0x46e   : > { %v840_v49 = vld [vmem:[#allocation3 + $0x8] sm:$0xff] }
 0x46f   : > { %629 = vst.msk [vmem:[#allocation3 + $0x10] sm:$0xff] %vm265_vm2, %v628_v48  ;;  %1149 = vrcp.f32 %v840_v49 }
 0x470   : > { %v497_v1 = vpop.permute.xlu1 %496 }
 0x471   : > { %v499_v2 = vmul.f32 %v497_v1, %v493_v63 }
 0x474   : > { %v762_v52 = vpop.xlane.xlu0 %761 }
 0x475   : > { %v763_v53 = vadd.f32 %v762_v52, %v759_v51 }
 0x476   : > { %v858_v54 = vld [vmem:[#allocation3 + $0x10] sm:$0xff] }
 0x477   : > { %764 = vst.msk [vmem:[#allocation3 + $0x18] sm:$0xff] %vm265_vm2, %v763_v53  ;;  %1151 = vrcp.f32 %v858_v54 }
 0x47c   : > { %v1150_v56 = vpop.eup %1149  ;;  %v357_v57 = vpop.permute.xlu0 %356 }
 0x47d   : > { %v359_v58 = vmul.f32 %v357_v57, %v353_v55  ;;  %845 = vperm.xlu0 %1127, %v1150_v56  }
 0x47e   : > { %v876_v59 = vld [vmem:[#allocation3 + $0x18] sm:$0xff] }
 0x47f   : > { %v408_v60 = vadd.f32 %v1313_v33, %v359_v58  ;;  %1153 = vrcp.f32 %v876_v59  ;;  %v770_v33 = vpop.permute.xlu1 %769 }
 0x480   : > { %v635_v7 = vpop.permute.xlu0 %634  ;;  %v772_v24 = vmul.f32 %v770_v33, %v766_v20 }
 0x481   : > { %409 = vst.msk [vmem:[#allocation4] sm:$0xff] %vm274_vm0, %v408_v60  ;;  %v637_v10 = vmul.f32 %v635_v7, %v631_v6 }
 0x484   : > { %v1152_v61 = vpop.eup %1151 }
 0x485   : > { %863 = vperm.xlu0 %1127, %v1152_v61  }
 0x488   : > { %v830_v14 = vld [vmem:[#allocation4] sm:$0xff] }
 0x48c   : > { %v1154_v62 = vpop.eup %1153 }
 0x48d   : > { %881 = vperm.xlu0 %1127, %v1154_v62  }
 0x4a0   : > { %v546_v3 = vpop.f32.mrf.mxu0 }
 0x4a1   : > { %v552_v4 = vadd.f32 %v546_v3, %v499_v2 }
 0x4a2   : > { %v1067_v5 = vpop.f32.mrf.mxu0 }
 0x4a3   : > { %553 = vst.msk [vmem:[#allocation4 + $0x8] sm:$0xff] %vm274_vm0, %v552_v4 }
 0x4a4   : > { %v549_v8 = vpop.f32.mrf.mxu0 }
 0x4a6   : > { %v1068_v9 = vpop.f32.mrf.mxu0 }
 0x4a8   : > { %v681_v11 = vpop.f32.mrf.mxu0 }
 0x4a9   : > { %v687_v12 = vadd.f32 %v681_v11, %v637_v10  ;;  %v834_v17 = vpop.permute.xlu1 %833 }
 0x4aa   : > { %v836_v18 = vmul.f32 %v834_v17, %v830_v14  ;;  %v1079_v19 = vpop.f32.mrf.mxu0  ;;  %v842_v31 = vld [vmem:[#allocation4 + $0x8] sm:$0xff] }
 0x4ab   : > { %688 = vst.msk [vmem:[#allocation4 + $0x10] sm:$0xff] %vm274_vm0, %v687_v12 }
 0x4ac   : > { %v837_v21 = vpack.c.bf16 %v836_v18, %v836_v18  ;;  %v684_v22 = vpop.f32.mrf.mxu0 }
 0x4ae   : > { %839 = vst.msk [vmem:[%s1367_s4] sm:$0xf] %vm838_vm4, %v837_v21  ;;  %v1080_v23 = vpop.f32.mrf.mxu0 }
 0x4b0   : > { %v816_v25 = vpop.f32.mrf.mxu0 }
 0x4b1   : > { %v822_v26 = vadd.f32 %v816_v25, %v772_v24 }
 0x4b2   : > { %v1091_v27 = vpop.f32.mrf.mxu0  ;;  %v860_v36 = vld [vmem:[#allocation4 + $0x10] sm:$0xff] }
 0x4b3   : > { %823 = vst.msk [vmem:[#allocation4 + $0x18] sm:$0xff] %vm274_vm0, %v822_v26 }
 0x4b4   : > { %v819_v28 = vpop.f32.mrf.mxu0 }
 0x4b6   : > { %v1092_v29 = vpop.f32.mrf.mxu0 }
 0x4ba   : > { %v878_v39 = vld [vmem:[#allocation4 + $0x18] sm:$0xff] }
 0x4f8   : > { %v846_v30 = vpop.permute.xlu0 %845 }
 0x4f9   : > { %v848_v32 = vmul.f32 %v846_v30, %v842_v31 }
 0x4fb   : > { %v1026_v34 = vpack.c.bf16 %v848_v32, %v848_v32 }
 0x4fd   : > { %853 = vrot.lane.b32.xlu1 %v1026_v34, %s1186_s5 }
 0x500   : > { %v864_v35 = vpop.permute.xlu0 %863 }
 0x501   : > { %v866_v37 = vmul.f32 %v864_v35, %v860_v36 }
 0x503   : > { %v1027_v0 = vpack.c.bf16 %v866_v37, %v866_v37 }
 0x505   : > { %871 = vrot.lane.b32.xlu1 %v1027_v0, %s1187_s6 }
 0x508   : > { %v882_v38 = vpop.permute.xlu0 %881 }
 0x509   : > { %v884_v40 = vmul.f32 %v882_v38, %v878_v39 }
 0x50b   : > { %v1028_v41 = vpack.c.bf16 %v884_v40, %v884_v40 }
 0x50d   : > { %889 = vrot.lane.b32.xlu1 %v1028_v41, %s1188_s7 }
 0x56f   : > { %v854_v13 = vpop.permute.xlu1 %853 }
 0x570   : > { %857 = vst.msk [vmem:[%s1367_s4] sm:$0xf] %vm856_vm5, %v854_v13 }
 0x577   : > { %v872_v15 = vpop.permute.xlu1 %871 }
 0x578   : > { %875 = vst.msk [vmem:[%s1367_s4] sm:$0xf] %vm874_vm6, %v872_v15 }
 0x57f   : > { %v890_v16 = vpop.permute.xlu1 %889 }
 0x580   : > { %893 = vst.msk [vmem:[%s1367_s4] sm:$0xf] %vm892_vm7, %v890_v16 }
 0x581 PF: > { %s13_s14 = sadd.s32 1, %s1177_s14   ;;  %s1387_s12 = smov %s1173_s13 }
 0x582   : > { %p10_p5 = scmp.ge.s32.totalorder %s13_s14, 4   ;;  %s1388_s13 = smov %s1390_s15 }
 0x584   :  { %12 = sbr.rel (!%p10_p5) target bundleno = 2 (0x2), region = 85 }

</bundles_post_ra>
